<compile_context>
chip_gen: v6e
topology: v6e:2x2x1
jax: 0.10.0
libtpu: 0.0.40
codegen_flags: <defaults>
</compile_context>

<pallas_src>
import jax
import jax.numpy as jnp
from jax.experimental import pallas as pl
from jax.experimental.pallas import tpu as pltpu

NEG_SLOPE = 0.2        # GATv2Conv default negative_slope
NUM_LAYERS = 3
EMB = 5                # graph_embedder output dim
GOAL_DIM = 6           # 5 + 5 + 5 + goal = 21  ->  goal dim = 6
HIDDEN = 10


def _elu(v):
    # torch.nn.functional.elu, alpha=1.0 (exp arg clamped so the unselected branch never overflows)
    return jnp.where(v > 0, v, jnp.exp(jnp.minimum(v, 0.0)) - 1.0)


def _gqn_kernel(x_ref, mask_ref, ea_ref, pool_ref, goal_ref,
                wlr_ref, lbias_ref, we_ref, att_ref,
                wg_ref, wq1_ref, wq2_ref, hbias_ref,
                o_ref):
    N, F = x_ref.shape

    # TODO(synk): F.dropout(p=0.6) / GATv2 attention dropout / nn.Dropout(0.5) are identity (eval mode).
    x = x_ref[...]                       # (N, F)
    mask = mask_ref[...]                 # (N, N)
    ea = ea_ref[...]                     # (N*N, Fe), row i*N + j

    # ---- 3 residual GATv2Conv(heads=1, edge_dim=Fe) layers, vectorized on the MXU ----
    for l in range(NUM_LAYERS):
        lbias = lbias_ref[l]                                                  # (1, 3F): [bl | br | cb]
        xlr = jnp.dot(x, wlr_ref[l], preferred_element_type=jnp.float32) + lbias[:, :2 * F]
        xl = xlr[:, :F]                                                       # lin_l(x): source transform
        xr = xlr[:, F:]                                                       # lin_r(x): target transform

        # edge-embedding term: one (N*N, Fe) @ (Fe, F) matmul, viewed as (N, N, F)
        ew = jnp.dot(ea, we_ref[l], preferred_element_type=jnp.float32).reshape(N, N, F)
        # pair[i, j, :] = xr[i] + xl[j] + ew[i, j]
        pair = xr[:, None, :] + xl[None, :, :] + ew
        pair = jnp.where(pair >= 0, pair, NEG_SLOPE * pair)                   # LeakyReLU(0.2)
        logits = jnp.sum(pair * att_ref[l], axis=-1)                          # att . pair  -> (N, N)

        # softmax over incoming edges (grouped by target row i), masked by adjacency
        logits = jnp.where(mask > 0, logits, jnp.float32(-1e30))
        m = jnp.max(logits, axis=-1, keepdims=True)
        e = jnp.exp(logits - m) * mask
        denom = jnp.sum(e, axis=-1, keepdims=True)                            # > 0 (self-loops always present)
        alpha = e * pl.reciprocal(denom, approx=True)                         # (N, N)

        out = jnp.dot(alpha, xl, preferred_element_type=jnp.float32) + lbias[:, 2 * F:]
        x = _elu(out) + x                                                     # F.elu then residual add

    # ---- graph_embedder + pooling (mean / action / visited-mean all in ONE matmul) ----
    hbias = hbias_ref[...]                                                    # (1, EMB+HIDDEN+1): [bg | bq1 | bq2]
    h = _elu(jnp.dot(x, wg_ref[...], preferred_element_type=jnp.float32) + hbias[:, :EMB])   # (N, EMB)
    pooled = jnp.dot(pool_ref[...], h, preferred_element_type=jnp.float32)    # (3, EMB): [g_emb; a_emb; v_emb]

    # ---- Q head: Linear(21 -> 10), ELU, Linear(10 -> 1) ----
    wq1 = wq1_ref[...]                                                        # (21, HIDDEN)
    q1 = (jnp.dot(pooled[0:1], wq1[0:EMB], preferred_element_type=jnp.float32)
          + jnp.dot(pooled[1:2], wq1[EMB:2 * EMB], preferred_element_type=jnp.float32)
          + jnp.dot(pooled[2:3], wq1[2 * EMB:3 * EMB], preferred_element_type=jnp.float32)
          + jnp.dot(goal_ref[...], wq1[3 * EMB:], preferred_element_type=jnp.float32)
          + hbias[:, EMB:EMB + HIDDEN])
    q1 = _elu(q1)                                                             # (1, HIDDEN)
    o_ref[...] = (jnp.dot(q1, wq2_ref[...], preferred_element_type=jnp.float32)
                  + hbias[:, EMB + HIDDEN:])


def init_params(key, num_node_features, num_edge_features):
    F, Fe = num_node_features, num_edge_features
    ks = iter(jax.random.split(key, 32))

    def u(shape, scale=0.5):
        return jax.random.uniform(next(ks), shape, jnp.float32, -1.0, 1.0) * scale

    p = {}
    # per-layer packed weights: [lin_l | lin_r]  and  biases [bl | br | conv_bias]
    p["wlr"] = jnp.stack([jnp.concatenate([u((F, F)), u((F, F))], axis=1)
                          for _ in range(NUM_LAYERS)])                         # (3, F, 2F)
    p["lbias"] = jnp.stack([jnp.concatenate([u((1, F)), u((1, F)), u((1, F))], axis=1)
                            for _ in range(NUM_LAYERS)])                       # (3, 1, 3F)
    p["we"] = jnp.stack([u((Fe, F)) for _ in range(NUM_LAYERS)])               # (3, Fe, F)  edge lin
    p["att"] = jnp.stack([u((1, F)) for _ in range(NUM_LAYERS)])               # (3, 1, F)   attention vec
    p["wg"] = u((F, EMB))                                                      # graph_embedder weight^T
    p["wq1"] = u((3 * EMB + GOAL_DIM, HIDDEN))                                 # Linear(21, 10) weight^T
    p["wq2"] = u((HIDDEN, 1))                                                  # Linear(10, 1)  weight^T
    # packed head biases: [bg | bq1 | bq2]
    p["hbias"] = jnp.concatenate([u((1, EMB)), u((1, HIDDEN)), u((1, 1))], axis=1)   # (1, 16)
    return p


def prepare_graph(x, edge_index, edge_attr, action_node_idx, goal, visited_subgraph_nodes):
    """Densify one graph into the kernel's per-graph tensors."""
    N, F = x.shape
    Fe = edge_attr.shape[1]
    src = edge_index[0]    # j (source)
    dst = edge_index[1]    # i (target)

    # GATv2Conv(add_self_loops=True, fill_value='mean'):
    # self-loop edge_attr of node i = mean of attrs of edges incoming to i (0 if none).
    attr_sum = jnp.zeros((N, Fe), jnp.float32).at[dst].add(edge_attr)
    in_cnt = jnp.zeros((N,), jnp.float32).at[dst].add(1.0)
    loop_attr = attr_sum / jnp.maximum(in_cnt, 1.0)[:, None]

    idx = jnp.arange(N)
    mask = jnp.zeros((N, N), jnp.float32).at[dst, src].set(1.0)
    mask = mask.at[idx, idx].set(1.0)

    # lane-dense flat edge attrs: row (i*N + j) = attrs of edge j -> i
    # (duplicate edges overwrite; assumes no duplicate edges, as before)
    ea_flat = jnp.zeros((N * N, Fe), jnp.float32).at[dst * N + src].set(edge_attr)
    ea_flat = ea_flat.at[idx * N + idx].set(loop_attr)

    # pooling matrix rows: global-mean, action one-hot, visited-mean (guarded against empty set)
    aoh = jax.nn.one_hot(action_node_idx, N, dtype=jnp.float32)
    vmask = jnp.zeros((N,), jnp.float32).at[visited_subgraph_nodes].set(1.0)
    v_cnt = jnp.maximum(jnp.sum(vmask), 1.0)
    pool = jnp.stack([jnp.full((N,), 1.0 / N, jnp.float32), aoh, vmask / v_cnt], axis=0)  # (3, N)

    goal_row = goal.reshape(1, -1).astype(jnp.float32)
    return x.astype(jnp.float32), mask, ea_flat, pool, goal_row


def graph_q_network_forward(params, x_b, mask_b, ea_b, pool_b, goal_b):
    """Run B graphs through the whole forward pass with a single pallas_call."""
    B, N, F = x_b.shape
    Fe = ea_b.shape[-1]

    def gspec(d1, d2):  # per-graph block: leading batch dim squeezed out
        return pl.BlockSpec((None, d1, d2), lambda b: (b, 0, 0))

    in_specs = [
        gspec(N, F),                                                    # x
        gspec(N, N),                                                    # mask
        gspec(N * N, Fe),                                               # ea_flat
        gspec(3, N),                                                    # pool
        gspec(1, GOAL_DIM),                                             # goal
        pl.BlockSpec((NUM_LAYERS, F, 2 * F), lambda b: (0, 0, 0)),      # wlr   (resident)
        pl.BlockSpec((NUM_LAYERS, 1, 3 * F), lambda b: (0, 0, 0)),      # lbias (resident)
        pl.BlockSpec((NUM_LAYERS, Fe, F), lambda b: (0, 0, 0)),         # we
        pl.BlockSpec((NUM_LAYERS, 1, F), lambda b: (0, 0, 0)),          # att
        pl.BlockSpec((F, EMB), lambda b: (0, 0)),                       # wg
        pl.BlockSpec((3 * EMB + GOAL_DIM, HIDDEN), lambda b: (0, 0)),   # wq1
        pl.BlockSpec((HIDDEN, 1), lambda b: (0, 0)),                    # wq2
        pl.BlockSpec((1, EMB + HIDDEN + 1), lambda b: (0, 0)),          # hbias
    ]

    out = pl.pallas_call(
        _gqn_kernel,
        out_shape=jax.ShapeDtypeStruct((B, 1, 1), jnp.float32),
        grid=(B,),
        in_specs=in_specs,
        out_specs=pl.BlockSpec((None, 1, 1), lambda b: (b, 0, 0)),
        compiler_params=pltpu.CompilerParams(dimension_semantics=("parallel",)),
    )(x_b, mask_b, ea_b, pool_b, goal_b,
      params["wlr"], params["lbias"], params["we"], params["att"],
      params["wg"], params["wq1"], params["wq2"], params["hbias"])

    return out.reshape(B)    # one q-value per graph (torch forward returns shape (1,) per graph)


if __name__ == "__main__":
    key = jax.random.PRNGKey(0)
    N, F, Fe = 8, 4, 3
    k0, k1, k2, k3, k4, k5, k6 = jax.random.split(key, 7)

    params = init_params(k0, F, Fe)

    # ---- graph 0: ring both ways + a few chords (no self-loops, no duplicates) ----
    src0 = jnp.array([0, 1, 2, 3, 4, 5, 6, 7, 1, 2, 3, 4, 5, 6, 7, 0, 0, 2, 4, 6], dtype=jnp.int32)
    dst0 = jnp.array([1, 2, 3, 4, 5, 6, 7, 0, 0, 1, 2, 3, 4, 5, 6, 7, 4, 6, 0, 2], dtype=jnp.int32)
    x0 = jax.random.normal(k1, (N, F), jnp.float32)
    ea0 = jax.random.normal(k2, (src0.shape[0], Fe), jnp.float32)
    goal0 = jax.random.normal(k3, (GOAL_DIM,), jnp.float32)
    g0 = prepare_graph(x0, jnp.stack([src0, dst0]), ea0,
                       action_node_idx=3, goal=goal0,
                       visited_subgraph_nodes=jnp.array([0, 2, 5], dtype=jnp.int32))

    # ---- graph 1: different edge set / features ----
    src1 = jnp.array([0, 0, 1, 1, 2, 3, 3, 4, 5, 5, 6, 7, 7, 2, 4, 6], dtype=jnp.int32)
    dst1 = jnp.array([1, 3, 2, 4, 5, 6, 0, 7, 0, 2, 1, 3, 5, 7, 6, 4], dtype=jnp.int32)
    x1 = jax.random.normal(k4, (N, F), jnp.float32)
    ea1 = jax.random.normal(k5, (src1.shape[0], Fe), jnp.float32)
    goal1 = jax.random.normal(k6, (GOAL_DIM,), jnp.float32)
    g1 = prepare_graph(x1, jnp.stack([src1, dst1]), ea1,
                       action_node_idx=6, goal=goal1,
                       visited_subgraph_nodes=jnp.array([1, 3, 4, 7], dtype=jnp.int32))

    # stack B=2 graphs and run the whole batch in one kernel launch
    x_b, mask_b, ea_b, pool_b, goal_b = (jnp.stack(t) for t in zip(g0, g1))
    qvals = graph_q_network_forward(params, x_b, mask_b, ea_b, pool_b, goal_b)
    jax.block_until_ready(qvals)
    print("KERNEL_OK")
</pallas_src>

<mosaic_0001>
module attributes {stable_mosaic.version = 11 : i64} {
  func.func @_gqn_kernel(%arg0: i32, %arg1: memref<1x8x4xf32, #tpu.memory_space<vmem>>, %arg2: memref<1x8x8xf32, #tpu.memory_space<vmem>>, %arg3: memref<1x64x3xf32, #tpu.memory_space<vmem>>, %arg4: memref<1x3x8xf32, #tpu.memory_space<vmem>>, %arg5: memref<1x1x6xf32, #tpu.memory_space<vmem>>, %arg6: memref<3x4x8xf32, #tpu.memory_space<vmem>>, %arg7: memref<3x1x12xf32, #tpu.memory_space<vmem>>, %arg8: memref<3x3x4xf32, #tpu.memory_space<vmem>>, %arg9: memref<3x1x4xf32, #tpu.memory_space<vmem>>, %arg10: memref<4x5xf32, #tpu.memory_space<vmem>>, %arg11: memref<21x10xf32, #tpu.memory_space<vmem>>, %arg12: memref<10x1xf32, #tpu.memory_space<vmem>>, %arg13: memref<1x16xf32, #tpu.memory_space<vmem>>, %arg14: memref<1x1x1xf32, #tpu.memory_space<vmem>>) attributes {dimension_semantics = [#tpu.dimension_semantics<parallel>], iteration_bounds = array<i64: 2>, scalar_prefetch = 0 : i64, scratch_operands = 0 : i64, tpu.core_type = #tpu.core_type<tc>, window_params = [{transform_indices = @transform_0, window_bounds = array<i64: 1, 8, 4>}, {transform_indices = @transform_1, window_bounds = array<i64: 1, 8, 8>}, {transform_indices = @transform_2, window_bounds = array<i64: 1, 64, 3>}, {transform_indices = @transform_3, window_bounds = array<i64: 1, 3, 8>}, {transform_indices = @transform_4, window_bounds = array<i64: 1, 1, 6>}, {pipeline_mode = #tpu.pipeline_mode<synchronous>, transform_indices = @transform_5, window_bounds = array<i64: 3, 4, 8>}, {pipeline_mode = #tpu.pipeline_mode<synchronous>, transform_indices = @transform_6, window_bounds = array<i64: 3, 1, 12>}, {pipeline_mode = #tpu.pipeline_mode<synchronous>, transform_indices = @transform_7, window_bounds = array<i64: 3, 3, 4>}, {pipeline_mode = #tpu.pipeline_mode<synchronous>, transform_indices = @transform_8, window_bounds = array<i64: 3, 1, 4>}, {pipeline_mode = #tpu.pipeline_mode<synchronous>, transform_indices = @transform_9, window_bounds = array<i64: 4, 5>}, {pipeline_mode = #tpu.pipeline_mode<synchronous>, transform_indices = @transform_10, window_bounds = array<i64: 21, 10>}, {pipeline_mode = #tpu.pipeline_mode<synchronous>, transform_indices = @transform_11, window_bounds = array<i64: 10, 1>}, {pipeline_mode = #tpu.pipeline_mode<synchronous>, transform_indices = @transform_12, window_bounds = array<i64: 1, 16>}, {transform_indices = @transform_13, window_bounds = array<i64: 1, 1, 1>}]} {
    %c0 = arith.constant 0 : index
    %c0_0 = arith.constant 0 : index
    %c0_1 = arith.constant 0 : index
    %0 = vector.load %arg1[%c0, %c0_0, %c0_1] : memref<1x8x4xf32, #tpu.memory_space<vmem>>, vector<1x8x4xf32>
    %1 = vector.shape_cast %0 : vector<1x8x4xf32> to vector<8x4xf32>
    %c0_2 = arith.constant 0 : index
    %c0_3 = arith.constant 0 : index
    %c0_4 = arith.constant 0 : index
    %2 = vector.load %arg2[%c0_2, %c0_3, %c0_4] : memref<1x8x8xf32, #tpu.memory_space<vmem>>, vector<1x8x8xf32>
    %3 = vector.shape_cast %2 : vector<1x8x8xf32> to vector<8x8xf32>
    %c0_5 = arith.constant 0 : index
    %c0_6 = arith.constant 0 : index
    %c0_7 = arith.constant 0 : index
    %4 = vector.load %arg3[%c0_5, %c0_6, %c0_7] : memref<1x64x3xf32, #tpu.memory_space<vmem>>, vector<1x64x3xf32>
    %5 = vector.shape_cast %4 : vector<1x64x3xf32> to vector<64x3xf32>
    %c0_8 = arith.constant 0 : index
    %c0_9 = arith.constant 0 : index
    %c0_10 = arith.constant 0 : index
    %6 = vector.load %arg7[%c0_8, %c0_9, %c0_10] : memref<3x1x12xf32, #tpu.memory_space<vmem>>, vector<1x1x12xf32>
    %7 = vector.shape_cast %6 : vector<1x1x12xf32> to vector<1x12xf32>
    %c0_11 = arith.constant 0 : index
    %c0_12 = arith.constant 0 : index
    %c0_13 = arith.constant 0 : index
    %8 = vector.load %arg6[%c0_11, %c0_12, %c0_13] : memref<3x4x8xf32, #tpu.memory_space<vmem>>, vector<1x4x8xf32>
    %9 = vector.shape_cast %8 : vector<1x4x8xf32> to vector<4x8xf32>
    %cst = arith.constant dense<0.000000e+00> : vector<8x8xf32>
    %10 = tpu.matmul %1, %9, %cst {dimension_numbers = #tpu.dot_dimension_numbers<[1], [0], [0], [1], [0, 0, 1, 1], [], []>} : vector<8x4xf32>, vector<4x8xf32>, vector<8x8xf32> -> vector<8x8xf32>
    %11 = vector.extract_strided_slice %7 {offsets = [0, 0], sizes = [1, 8], strides = [1, 1]} : vector<1x12xf32> to vector<1x8xf32>
    %12 = vector.broadcast %11 : vector<1x8xf32> to vector<8x8xf32>
    %13 = arith.addf %10, %12 : vector<8x8xf32>
    %14 = vector.extract_strided_slice %13 {offsets = [0, 0], sizes = [8, 4], strides = [1, 1]} : vector<8x8xf32> to vector<8x4xf32>
    %15 = vector.extract_strided_slice %13 {offsets = [0, 4], sizes = [8, 4], strides = [1, 1]} : vector<8x8xf32> to vector<8x4xf32>
    %c0_14 = arith.constant 0 : index
    %c0_15 = arith.constant 0 : index
    %c0_16 = arith.constant 0 : index
    %16 = vector.load %arg8[%c0_14, %c0_15, %c0_16] : memref<3x3x4xf32, #tpu.memory_space<vmem>>, vector<1x3x4xf32>
    %17 = vector.shape_cast %16 : vector<1x3x4xf32> to vector<3x4xf32>
    %cst_17 = arith.constant dense<0.000000e+00> : vector<64x4xf32>
    %18 = tpu.matmul %5, %17, %cst_17 {dimension_numbers = #tpu.dot_dimension_numbers<[1], [0], [0], [1], [0, 0, 1, 1], [], []>} : vector<64x3xf32>, vector<3x4xf32>, vector<64x4xf32> -> vector<64x4xf32>
    %19 = vector.shape_cast %18 : vector<64x4xf32> to vector<8x8x4xf32>
    %20 = vector.shape_cast %15 : vector<8x4xf32> to vector<8x1x4xf32>
    %21 = vector.shape_cast %14 : vector<8x4xf32> to vector<1x8x4xf32>
    %22 = vector.broadcast %20 : vector<8x1x4xf32> to vector<8x8x4xf32>
    %23 = vector.broadcast %21 : vector<1x8x4xf32> to vector<8x8x4xf32>
    %24 = arith.addf %22, %23 : vector<8x8x4xf32>
    %25 = arith.addf %24, %19 : vector<8x8x4xf32>
    %cst_18 = arith.constant 0.000000e+00 : f32
    %26 = vector.broadcast %cst_18 : f32 to vector<8x8x4xf32>
    %27 = arith.cmpf oge, %25, %26 : vector<8x8x4xf32>
    %cst_19 = arith.constant 2.000000e-01 : f32
    %28 = vector.broadcast %cst_19 : f32 to vector<8x8x4xf32>
    %29 = arith.mulf %28, %25 : vector<8x8x4xf32>
    %30 = arith.select %27, %25, %29 : vector<8x8x4xi1>, vector<8x8x4xf32>
    %c0_20 = arith.constant 0 : index
    %c0_21 = arith.constant 0 : index
    %c0_22 = arith.constant 0 : index
    %31 = vector.load %arg9[%c0_20, %c0_21, %c0_22] : memref<3x1x4xf32, #tpu.memory_space<vmem>>, vector<1x1x4xf32>
    %32 = vector.shape_cast %31 : vector<1x1x4xf32> to vector<1x4xf32>
    %33 = vector.shape_cast %32 : vector<1x4xf32> to vector<1x1x4xf32>
    %34 = vector.broadcast %33 : vector<1x1x4xf32> to vector<8x8x4xf32>
    %35 = arith.mulf %30, %34 : vector<8x8x4xf32>
    %cst_23 = arith.constant dense<0.000000e+00> : vector<8x8xf32>
    %36 = vector.multi_reduction <add>, %35, %cst_23 [2] : vector<8x8x4xf32> to vector<8x8xf32>
    %cst_24 = arith.constant 0.000000e+00 : f32
    %37 = vector.broadcast %cst_24 : f32 to vector<8x8xf32>
    %38 = arith.cmpf ogt, %3, %37 : vector<8x8xf32>
    %cst_25 = arith.constant -1.000000e+30 : f32
    %39 = vector.broadcast %cst_25 : f32 to vector<8x8xf32>
    %40 = arith.select %38, %36, %39 : vector<8x8xi1>, vector<8x8xf32>
    %cst_26 = arith.constant dense<0xFF800000> : vector<8xf32>
    %41 = vector.multi_reduction <maximumf>, %40, %cst_26 [1] : vector<8x8xf32> to vector<8xf32>
    %42 = vector.shape_cast %41 : vector<8xf32> to vector<8x1xf32>
    %43 = vector.broadcast %42 : vector<8x1xf32> to vector<8x8xf32>
    %44 = arith.subf %40, %43 : vector<8x8xf32>
    %45 = math.exp %44 : vector<8x8xf32>
    %46 = arith.mulf %45, %3 : vector<8x8xf32>
    %cst_27 = arith.constant dense<0.000000e+00> : vector<8xf32>
    %47 = vector.multi_reduction <add>, %46, %cst_27 [1] : vector<8x8xf32> to vector<8xf32>
    %48 = vector.shape_cast %47 : vector<8xf32> to vector<8x1xf32>
    %49 = tpu.reciprocal %48 {approx = true} : vector<8x1xf32> -> vector<8x1xf32>
    %50 = vector.broadcast %49 : vector<8x1xf32> to vector<8x8xf32>
    %51 = arith.mulf %46, %50 : vector<8x8xf32>
    %cst_28 = arith.constant dense<0.000000e+00> : vector<8x4xf32>
    %52 = tpu.matmul %51, %14, %cst_28 {dimension_numbers = #tpu.dot_dimension_numbers<[1], [0], [0], [1], [0, 0, 1, 1], [], []>} : vector<8x8xf32>, vector<8x4xf32>, vector<8x4xf32> -> vector<8x4xf32>
    %53 = vector.extract_strided_slice %7 {offsets = [0, 8], sizes = [1, 4], strides = [1, 1]} : vector<1x12xf32> to vector<1x4xf32>
    %54 = vector.broadcast %53 : vector<1x4xf32> to vector<8x4xf32>
    %55 = arith.addf %52, %54 : vector<8x4xf32>
    %cst_29 = arith.constant 0.000000e+00 : f32
    %56 = vector.broadcast %cst_29 : f32 to vector<8x4xf32>
    %57 = arith.cmpf ogt, %55, %56 : vector<8x4xf32>
    %cst_30 = arith.constant 0.000000e+00 : f32
    %58 = vector.broadcast %cst_30 : f32 to vector<8x4xf32>
    %59 = arith.minimumf %55, %58 : vector<8x4xf32>
    %60 = math.exp %59 : vector<8x4xf32>
    %cst_31 = arith.constant 1.000000e+00 : f32
    %61 = vector.broadcast %cst_31 : f32 to vector<8x4xf32>
    %62 = arith.subf %60, %61 : vector<8x4xf32>
    %63 = arith.select %57, %55, %62 : vector<8x4xi1>, vector<8x4xf32>
    %64 = arith.addf %63, %1 : vector<8x4xf32>
    %c1 = arith.constant 1 : index
    %c0_32 = arith.constant 0 : index
    %c0_33 = arith.constant 0 : index
    %65 = vector.load %arg7[%c1, %c0_32, %c0_33] : memref<3x1x12xf32, #tpu.memory_space<vmem>>, vector<1x1x12xf32>
    %66 = vector.shape_cast %65 : vector<1x1x12xf32> to vector<1x12xf32>
    %c1_34 = arith.constant 1 : index
    %c0_35 = arith.constant 0 : index
    %c0_36 = arith.constant 0 : index
    %67 = vector.load %arg6[%c1_34, %c0_35, %c0_36] : memref<3x4x8xf32, #tpu.memory_space<vmem>>, vector<1x4x8xf32>
    %68 = vector.shape_cast %67 : vector<1x4x8xf32> to vector<4x8xf32>
    %cst_37 = arith.constant dense<0.000000e+00> : vector<8x8xf32>
    %69 = tpu.matmul %64, %68, %cst_37 {dimension_numbers = #tpu.dot_dimension_numbers<[1], [0], [0], [1], [0, 0, 1, 1], [], []>} : vector<8x4xf32>, vector<4x8xf32>, vector<8x8xf32> -> vector<8x8xf32>
    %70 = vector.extract_strided_slice %66 {offsets = [0, 0], sizes = [1, 8], strides = [1, 1]} : vector<1x12xf32> to vector<1x8xf32>
    %71 = vector.broadcast %70 : vector<1x8xf32> to vector<8x8xf32>
    %72 = arith.addf %69, %71 : vector<8x8xf32>
    %73 = vector.extract_strided_slice %72 {offsets = [0, 0], sizes = [8, 4], strides = [1, 1]} : vector<8x8xf32> to vector<8x4xf32>
    %74 = vector.extract_strided_slice %72 {offsets = [0, 4], sizes = [8, 4], strides = [1, 1]} : vector<8x8xf32> to vector<8x4xf32>
    %c1_38 = arith.constant 1 : index
    %c0_39 = arith.constant 0 : index
    %c0_40 = arith.constant 0 : index
    %75 = vector.load %arg8[%c1_38, %c0_39, %c0_40] : memref<3x3x4xf32, #tpu.memory_space<vmem>>, vector<1x3x4xf32>
    %76 = vector.shape_cast %75 : vector<1x3x4xf32> to vector<3x4xf32>
    %cst_41 = arith.constant dense<0.000000e+00> : vector<64x4xf32>
    %77 = tpu.matmul %5, %76, %cst_41 {dimension_numbers = #tpu.dot_dimension_numbers<[1], [0], [0], [1], [0, 0, 1, 1], [], []>} : vector<64x3xf32>, vector<3x4xf32>, vector<64x4xf32> -> vector<64x4xf32>
    %78 = vector.shape_cast %77 : vector<64x4xf32> to vector<8x8x4xf32>
    %79 = vector.shape_cast %74 : vector<8x4xf32> to vector<8x1x4xf32>
    %80 = vector.shape_cast %73 : vector<8x4xf32> to vector<1x8x4xf32>
    %81 = vector.broadcast %79 : vector<8x1x4xf32> to vector<8x8x4xf32>
    %82 = vector.broadcast %80 : vector<1x8x4xf32> to vector<8x8x4xf32>
    %83 = arith.addf %81, %82 : vector<8x8x4xf32>
    %84 = arith.addf %83, %78 : vector<8x8x4xf32>
    %cst_42 = arith.constant 0.000000e+00 : f32
    %85 = vector.broadcast %cst_42 : f32 to vector<8x8x4xf32>
    %86 = arith.cmpf oge, %84, %85 : vector<8x8x4xf32>
    %cst_43 = arith.constant 2.000000e-01 : f32
    %87 = vector.broadcast %cst_43 : f32 to vector<8x8x4xf32>
    %88 = arith.mulf %87, %84 : vector<8x8x4xf32>
    %89 = arith.select %86, %84, %88 : vector<8x8x4xi1>, vector<8x8x4xf32>
    %c1_44 = arith.constant 1 : index
    %c0_45 = arith.constant 0 : index
    %c0_46 = arith.constant 0 : index
    %90 = vector.load %arg9[%c1_44, %c0_45, %c0_46] : memref<3x1x4xf32, #tpu.memory_space<vmem>>, vector<1x1x4xf32>
    %91 = vector.shape_cast %90 : vector<1x1x4xf32> to vector<1x4xf32>
    %92 = vector.shape_cast %91 : vector<1x4xf32> to vector<1x1x4xf32>
    %93 = vector.broadcast %92 : vector<1x1x4xf32> to vector<8x8x4xf32>
    %94 = arith.mulf %89, %93 : vector<8x8x4xf32>
    %cst_47 = arith.constant dense<0.000000e+00> : vector<8x8xf32>
    %95 = vector.multi_reduction <add>, %94, %cst_47 [2] : vector<8x8x4xf32> to vector<8x8xf32>
    %cst_48 = arith.constant 0.000000e+00 : f32
    %96 = vector.broadcast %cst_48 : f32 to vector<8x8xf32>
    %97 = arith.cmpf ogt, %3, %96 : vector<8x8xf32>
    %cst_49 = arith.constant -1.000000e+30 : f32
    %98 = vector.broadcast %cst_49 : f32 to vector<8x8xf32>
    %99 = arith.select %97, %95, %98 : vector<8x8xi1>, vector<8x8xf32>
    %cst_50 = arith.constant dense<0xFF800000> : vector<8xf32>
    %100 = vector.multi_reduction <maximumf>, %99, %cst_50 [1] : vector<8x8xf32> to vector<8xf32>
    %101 = vector.shape_cast %100 : vector<8xf32> to vector<8x1xf32>
    %102 = vector.broadcast %101 : vector<8x1xf32> to vector<8x8xf32>
    %103 = arith.subf %99, %102 : vector<8x8xf32>
    %104 = math.exp %103 : vector<8x8xf32>
    %105 = arith.mulf %104, %3 : vector<8x8xf32>
    %cst_51 = arith.constant dense<0.000000e+00> : vector<8xf32>
    %106 = vector.multi_reduction <add>, %105, %cst_51 [1] : vector<8x8xf32> to vector<8xf32>
    %107 = vector.shape_cast %106 : vector<8xf32> to vector<8x1xf32>
    %108 = tpu.reciprocal %107 {approx = true} : vector<8x1xf32> -> vector<8x1xf32>
    %109 = vector.broadcast %108 : vector<8x1xf32> to vector<8x8xf32>
    %110 = arith.mulf %105, %109 : vector<8x8xf32>
    %cst_52 = arith.constant dense<0.000000e+00> : vector<8x4xf32>
    %111 = tpu.matmul %110, %73, %cst_52 {dimension_numbers = #tpu.dot_dimension_numbers<[1], [0], [0], [1], [0, 0, 1, 1], [], []>} : vector<8x8xf32>, vector<8x4xf32>, vector<8x4xf32> -> vector<8x4xf32>
    %112 = vector.extract_strided_slice %66 {offsets = [0, 8], sizes = [1, 4], strides = [1, 1]} : vector<1x12xf32> to vector<1x4xf32>
    %113 = vector.broadcast %112 : vector<1x4xf32> to vector<8x4xf32>
    %114 = arith.addf %111, %113 : vector<8x4xf32>
    %cst_53 = arith.constant 0.000000e+00 : f32
    %115 = vector.broadcast %cst_53 : f32 to vector<8x4xf32>
    %116 = arith.cmpf ogt, %114, %115 : vector<8x4xf32>
    %cst_54 = arith.constant 0.000000e+00 : f32
    %117 = vector.broadcast %cst_54 : f32 to vector<8x4xf32>
    %118 = arith.minimumf %114, %117 : vector<8x4xf32>
    %119 = math.exp %118 : vector<8x4xf32>
    %cst_55 = arith.constant 1.000000e+00 : f32
    %120 = vector.broadcast %cst_55 : f32 to vector<8x4xf32>
    %121 = arith.subf %119, %120 : vector<8x4xf32>
    %122 = arith.select %116, %114, %121 : vector<8x4xi1>, vector<8x4xf32>
    %123 = arith.addf %122, %64 : vector<8x4xf32>
    %c2 = arith.constant 2 : index
    %c0_56 = arith.constant 0 : index
    %c0_57 = arith.constant 0 : index
    %124 = vector.load %arg7[%c2, %c0_56, %c0_57] : memref<3x1x12xf32, #tpu.memory_space<vmem>>, vector<1x1x12xf32>
    %125 = vector.shape_cast %124 : vector<1x1x12xf32> to vector<1x12xf32>
    %c2_58 = arith.constant 2 : index
    %c0_59 = arith.constant 0 : index
    %c0_60 = arith.constant 0 : index
    %126 = vector.load %arg6[%c2_58, %c0_59, %c0_60] : memref<3x4x8xf32, #tpu.memory_space<vmem>>, vector<1x4x8xf32>
    %127 = vector.shape_cast %126 : vector<1x4x8xf32> to vector<4x8xf32>
    %cst_61 = arith.constant dense<0.000000e+00> : vector<8x8xf32>
    %128 = tpu.matmul %123, %127, %cst_61 {dimension_numbers = #tpu.dot_dimension_numbers<[1], [0], [0], [1], [0, 0, 1, 1], [], []>} : vector<8x4xf32>, vector<4x8xf32>, vector<8x8xf32> -> vector<8x8xf32>
    %129 = vector.extract_strided_slice %125 {offsets = [0, 0], sizes = [1, 8], strides = [1, 1]} : vector<1x12xf32> to vector<1x8xf32>
    %130 = vector.broadcast %129 : vector<1x8xf32> to vector<8x8xf32>
    %131 = arith.addf %128, %130 : vector<8x8xf32>
    %132 = vector.extract_strided_slice %131 {offsets = [0, 0], sizes = [8, 4], strides = [1, 1]} : vector<8x8xf32> to vector<8x4xf32>
    %133 = vector.extract_strided_slice %131 {offsets = [0, 4], sizes = [8, 4], strides = [1, 1]} : vector<8x8xf32> to vector<8x4xf32>
    %c2_62 = arith.constant 2 : index
    %c0_63 = arith.constant 0 : index
    %c0_64 = arith.constant 0 : index
    %134 = vector.load %arg8[%c2_62, %c0_63, %c0_64] : memref<3x3x4xf32, #tpu.memory_space<vmem>>, vector<1x3x4xf32>
    %135 = vector.shape_cast %134 : vector<1x3x4xf32> to vector<3x4xf32>
    %cst_65 = arith.constant dense<0.000000e+00> : vector<64x4xf32>
    %136 = tpu.matmul %5, %135, %cst_65 {dimension_numbers = #tpu.dot_dimension_numbers<[1], [0], [0], [1], [0, 0, 1, 1], [], []>} : vector<64x3xf32>, vector<3x4xf32>, vector<64x4xf32> -> vector<64x4xf32>
    %137 = vector.shape_cast %136 : vector<64x4xf32> to vector<8x8x4xf32>
    %138 = vector.shape_cast %133 : vector<8x4xf32> to vector<8x1x4xf32>
    %139 = vector.shape_cast %132 : vector<8x4xf32> to vector<1x8x4xf32>
    %140 = vector.broadcast %138 : vector<8x1x4xf32> to vector<8x8x4xf32>
    %141 = vector.broadcast %139 : vector<1x8x4xf32> to vector<8x8x4xf32>
    %142 = arith.addf %140, %141 : vector<8x8x4xf32>
    %143 = arith.addf %142, %137 : vector<8x8x4xf32>
    %cst_66 = arith.constant 0.000000e+00 : f32
    %144 = vector.broadcast %cst_66 : f32 to vector<8x8x4xf32>
    %145 = arith.cmpf oge, %143, %144 : vector<8x8x4xf32>
    %cst_67 = arith.constant 2.000000e-01 : f32
    %146 = vector.broadcast %cst_67 : f32 to vector<8x8x4xf32>
    %147 = arith.mulf %146, %143 : vector<8x8x4xf32>
    %148 = arith.select %145, %143, %147 : vector<8x8x4xi1>, vector<8x8x4xf32>
    %c2_68 = arith.constant 2 : index
    %c0_69 = arith.constant 0 : index
    %c0_70 = arith.constant 0 : index
    %149 = vector.load %arg9[%c2_68, %c0_69, %c0_70] : memref<3x1x4xf32, #tpu.memory_space<vmem>>, vector<1x1x4xf32>
    %150 = vector.shape_cast %149 : vector<1x1x4xf32> to vector<1x4xf32>
    %151 = vector.shape_cast %150 : vector<1x4xf32> to vector<1x1x4xf32>
    %152 = vector.broadcast %151 : vector<1x1x4xf32> to vector<8x8x4xf32>
    %153 = arith.mulf %148, %152 : vector<8x8x4xf32>
    %cst_71 = arith.constant dense<0.000000e+00> : vector<8x8xf32>
    %154 = vector.multi_reduction <add>, %153, %cst_71 [2] : vector<8x8x4xf32> to vector<8x8xf32>
    %cst_72 = arith.constant 0.000000e+00 : f32
    %155 = vector.broadcast %cst_72 : f32 to vector<8x8xf32>
    %156 = arith.cmpf ogt, %3, %155 : vector<8x8xf32>
    %cst_73 = arith.constant -1.000000e+30 : f32
    %157 = vector.broadcast %cst_73 : f32 to vector<8x8xf32>
    %158 = arith.select %156, %154, %157 : vector<8x8xi1>, vector<8x8xf32>
    %cst_74 = arith.constant dense<0xFF800000> : vector<8xf32>
    %159 = vector.multi_reduction <maximumf>, %158, %cst_74 [1] : vector<8x8xf32> to vector<8xf32>
    %160 = vector.shape_cast %159 : vector<8xf32> to vector<8x1xf32>
    %161 = vector.broadcast %160 : vector<8x1xf32> to vector<8x8xf32>
    %162 = arith.subf %158, %161 : vector<8x8xf32>
    %163 = math.exp %162 : vector<8x8xf32>
    %164 = arith.mulf %163, %3 : vector<8x8xf32>
    %cst_75 = arith.constant dense<0.000000e+00> : vector<8xf32>
    %165 = vector.multi_reduction <add>, %164, %cst_75 [1] : vector<8x8xf32> to vector<8xf32>
    %166 = vector.shape_cast %165 : vector<8xf32> to vector<8x1xf32>
    %167 = tpu.reciprocal %166 {approx = true} : vector<8x1xf32> -> vector<8x1xf32>
    %168 = vector.broadcast %167 : vector<8x1xf32> to vector<8x8xf32>
    %169 = arith.mulf %164, %168 : vector<8x8xf32>
    %cst_76 = arith.constant dense<0.000000e+00> : vector<8x4xf32>
    %170 = tpu.matmul %169, %132, %cst_76 {dimension_numbers = #tpu.dot_dimension_numbers<[1], [0], [0], [1], [0, 0, 1, 1], [], []>} : vector<8x8xf32>, vector<8x4xf32>, vector<8x4xf32> -> vector<8x4xf32>
    %171 = vector.extract_strided_slice %125 {offsets = [0, 8], sizes = [1, 4], strides = [1, 1]} : vector<1x12xf32> to vector<1x4xf32>
    %172 = vector.broadcast %171 : vector<1x4xf32> to vector<8x4xf32>
    %173 = arith.addf %170, %172 : vector<8x4xf32>
    %cst_77 = arith.constant 0.000000e+00 : f32
    %174 = vector.broadcast %cst_77 : f32 to vector<8x4xf32>
    %175 = arith.cmpf ogt, %173, %174 : vector<8x4xf32>
    %cst_78 = arith.constant 0.000000e+00 : f32
    %176 = vector.broadcast %cst_78 : f32 to vector<8x4xf32>
    %177 = arith.minimumf %173, %176 : vector<8x4xf32>
    %178 = math.exp %177 : vector<8x4xf32>
    %cst_79 = arith.constant 1.000000e+00 : f32
    %179 = vector.broadcast %cst_79 : f32 to vector<8x4xf32>
    %180 = arith.subf %178, %179 : vector<8x4xf32>
    %181 = arith.select %175, %173, %180 : vector<8x4xi1>, vector<8x4xf32>
    %182 = arith.addf %181, %123 : vector<8x4xf32>
    %c0_80 = arith.constant 0 : index
    %c0_81 = arith.constant 0 : index
    %183 = vector.load %arg13[%c0_80, %c0_81] : memref<1x16xf32, #tpu.memory_space<vmem>>, vector<1x16xf32>
    %c0_82 = arith.constant 0 : index
    %c0_83 = arith.constant 0 : index
    %184 = vector.load %arg10[%c0_82, %c0_83] : memref<4x5xf32, #tpu.memory_space<vmem>>, vector<4x5xf32>
    %cst_84 = arith.constant dense<0.000000e+00> : vector<8x5xf32>
    %185 = tpu.matmul %182, %184, %cst_84 {dimension_numbers = #tpu.dot_dimension_numbers<[1], [0], [0], [1], [0, 0, 1, 1], [], []>} : vector<8x4xf32>, vector<4x5xf32>, vector<8x5xf32> -> vector<8x5xf32>
    %186 = vector.extract_strided_slice %183 {offsets = [0, 0], sizes = [1, 5], strides = [1, 1]} : vector<1x16xf32> to vector<1x5xf32>
    %187 = vector.broadcast %186 : vector<1x5xf32> to vector<8x5xf32>
    %188 = arith.addf %185, %187 : vector<8x5xf32>
    %cst_85 = arith.constant 0.000000e+00 : f32
    %189 = vector.broadcast %cst_85 : f32 to vector<8x5xf32>
    %190 = arith.cmpf ogt, %188, %189 : vector<8x5xf32>
    %cst_86 = arith.constant 0.000000e+00 : f32
    %191 = vector.broadcast %cst_86 : f32 to vector<8x5xf32>
    %192 = arith.minimumf %188, %191 : vector<8x5xf32>
    %193 = math.exp %192 : vector<8x5xf32>
    %cst_87 = arith.constant 1.000000e+00 : f32
    %194 = vector.broadcast %cst_87 : f32 to vector<8x5xf32>
    %195 = arith.subf %193, %194 : vector<8x5xf32>
    %196 = arith.select %190, %188, %195 : vector<8x5xi1>, vector<8x5xf32>
    %c0_88 = arith.constant 0 : index
    %c0_89 = arith.constant 0 : index
    %c0_90 = arith.constant 0 : index
    %197 = vector.load %arg4[%c0_88, %c0_89, %c0_90] : memref<1x3x8xf32, #tpu.memory_space<vmem>>, vector<1x3x8xf32>
    %198 = vector.shape_cast %197 : vector<1x3x8xf32> to vector<3x8xf32>
    %cst_91 = arith.constant dense<0.000000e+00> : vector<3x5xf32>
    %199 = tpu.matmul %198, %196, %cst_91 {dimension_numbers = #tpu.dot_dimension_numbers<[1], [0], [0], [1], [0, 0, 1, 1], [], []>} : vector<3x8xf32>, vector<8x5xf32>, vector<3x5xf32> -> vector<3x5xf32>
    %c0_92 = arith.constant 0 : index
    %c0_93 = arith.constant 0 : index
    %200 = vector.load %arg11[%c0_92, %c0_93] : memref<21x10xf32, #tpu.memory_space<vmem>>, vector<21x10xf32>
    %201 = vector.extract_strided_slice %199 {offsets = [0, 0], sizes = [1, 5], strides = [1, 1]} : vector<3x5xf32> to vector<1x5xf32>
    %202 = vector.extract_strided_slice %200 {offsets = [0, 0], sizes = [5, 10], strides = [1, 1]} : vector<21x10xf32> to vector<5x10xf32>
    %cst_94 = arith.constant dense<0.000000e+00> : vector<1x10xf32>
    %203 = tpu.matmul %201, %202, %cst_94 {dimension_numbers = #tpu.dot_dimension_numbers<[1], [0], [0], [1], [0, 0, 1, 1], [], []>} : vector<1x5xf32>, vector<5x10xf32>, vector<1x10xf32> -> vector<1x10xf32>
    %204 = vector.extract_strided_slice %199 {offsets = [1, 0], sizes = [1, 5], strides = [1, 1]} : vector<3x5xf32> to vector<1x5xf32>
    %205 = vector.extract_strided_slice %200 {offsets = [5, 0], sizes = [5, 10], strides = [1, 1]} : vector<21x10xf32> to vector<5x10xf32>
    %cst_95 = arith.constant dense<0.000000e+00> : vector<1x10xf32>
    %206 = tpu.matmul %204, %205, %cst_95 {dimension_numbers = #tpu.dot_dimension_numbers<[1], [0], [0], [1], [0, 0, 1, 1], [], []>} : vector<1x5xf32>, vector<5x10xf32>, vector<1x10xf32> -> vector<1x10xf32>
    %207 = arith.addf %203, %206 : vector<1x10xf32>
    %208 = vector.extract_strided_slice %199 {offsets = [2, 0], sizes = [1, 5], strides = [1, 1]} : vector<3x5xf32> to vector<1x5xf32>
    %209 = vector.extract_strided_slice %200 {offsets = [10, 0], sizes = [5, 10], strides = [1, 1]} : vector<21x10xf32> to vector<5x10xf32>
    %cst_96 = arith.constant dense<0.000000e+00> : vector<1x10xf32>
    %210 = tpu.matmul %208, %209, %cst_96 {dimension_numbers = #tpu.dot_dimension_numbers<[1], [0], [0], [1], [0, 0, 1, 1], [], []>} : vector<1x5xf32>, vector<5x10xf32>, vector<1x10xf32> -> vector<1x10xf32>
    %211 = arith.addf %207, %210 : vector<1x10xf32>
    %c0_97 = arith.constant 0 : index
    %c0_98 = arith.constant 0 : index
    %c0_99 = arith.constant 0 : index
    %212 = vector.load %arg5[%c0_97, %c0_98, %c0_99] : memref<1x1x6xf32, #tpu.memory_space<vmem>>, vector<1x1x6xf32>
    %213 = vector.shape_cast %212 : vector<1x1x6xf32> to vector<1x6xf32>
    %214 = vector.extract_strided_slice %200 {offsets = [15, 0], sizes = [6, 10], strides = [1, 1]} : vector<21x10xf32> to vector<6x10xf32>
    %cst_100 = arith.constant dense<0.000000e+00> : vector<1x10xf32>
    %215 = tpu.matmul %213, %214, %cst_100 {dimension_numbers = #tpu.dot_dimension_numbers<[1], [0], [0], [1], [0, 0, 1, 1], [], []>} : vector<1x6xf32>, vector<6x10xf32>, vector<1x10xf32> -> vector<1x10xf32>
    %216 = arith.addf %211, %215 : vector<1x10xf32>
    %217 = vector.extract_strided_slice %183 {offsets = [0, 5], sizes = [1, 10], strides = [1, 1]} : vector<1x16xf32> to vector<1x10xf32>
    %218 = arith.addf %216, %217 : vector<1x10xf32>
    %cst_101 = arith.constant 0.000000e+00 : f32
    %219 = vector.broadcast %cst_101 : f32 to vector<1x10xf32>
    %220 = arith.cmpf ogt, %218, %219 : vector<1x10xf32>
    %cst_102 = arith.constant 0.000000e+00 : f32
    %221 = vector.broadcast %cst_102 : f32 to vector<1x10xf32>
    %222 = arith.minimumf %218, %221 : vector<1x10xf32>
    %223 = math.exp %222 : vector<1x10xf32>
    %cst_103 = arith.constant 1.000000e+00 : f32
    %224 = vector.broadcast %cst_103 : f32 to vector<1x10xf32>
    %225 = arith.subf %223, %224 : vector<1x10xf32>
    %226 = arith.select %220, %218, %225 : vector<1x10xi1>, vector<1x10xf32>
    %c0_104 = arith.constant 0 : index
    %c0_105 = arith.constant 0 : index
    %227 = vector.load %arg12[%c0_104, %c0_105] : memref<10x1xf32, #tpu.memory_space<vmem>>, vector<10x1xf32>
    %cst_106 = arith.constant dense<0.000000e+00> : vector<1x1xf32>
    %228 = tpu.matmul %226, %227, %cst_106 {dimension_numbers = #tpu.dot_dimension_numbers<[1], [0], [0], [1], [0, 0, 1, 1], [], []>} : vector<1x10xf32>, vector<10x1xf32>, vector<1x1xf32> -> vector<1x1xf32>
    %229 = vector.extract_strided_slice %183 {offsets = [0, 15], sizes = [1, 1], strides = [1, 1]} : vector<1x16xf32> to vector<1x1xf32>
    %230 = arith.addf %228, %229 : vector<1x1xf32>
    %c0_107 = arith.constant 0 : index
    %c0_108 = arith.constant 0 : index
    %c0_109 = arith.constant 0 : index
    %231 = vector.load %arg14[%c0_107, %c0_108, %c0_109] : memref<1x1x1xf32, #tpu.memory_space<vmem>>, vector<1x1x1xf32>
    %232 = vector.shape_cast %231 : vector<1x1x1xf32> to vector<1x1xf32>
    %233 = vector.shape_cast %230 : vector<1x1xf32> to vector<1x1x1xf32>
    tpu.vector_store %arg14[%c0_107, %c0_108, %c0_109], %233 {strides = array<i32>} : memref<1x1x1xf32, #tpu.memory_space<vmem>>, vector<1x1x1xf32>,
    return
  }
  func.func @transform_0(%arg0: i32) -> (i32, i32, i32) {
    %c0_i32 = arith.constant 0 : i32
    %c0_i32_0 = arith.constant 0 : i32
    %c0_i32_1 = arith.constant 0 : i32
    return %arg0, %c0_i32, %c0_i32_0 : i32, i32, i32
  }
  func.func @transform_1(%arg0: i32) -> (i32, i32, i32) {
    %c0_i32 = arith.constant 0 : i32
    %c0_i32_0 = arith.constant 0 : i32
    %c0_i32_1 = arith.constant 0 : i32
    return %arg0, %c0_i32, %c0_i32_0 : i32, i32, i32
  }
  func.func @transform_2(%arg0: i32) -> (i32, i32, i32) {
    %c0_i32 = arith.constant 0 : i32
    %c0_i32_0 = arith.constant 0 : i32
    %c0_i32_1 = arith.constant 0 : i32
    return %arg0, %c0_i32, %c0_i32_0 : i32, i32, i32
  }
  func.func @transform_3(%arg0: i32) -> (i32, i32, i32) {
    %c0_i32 = arith.constant 0 : i32
    %c0_i32_0 = arith.constant 0 : i32
    %c0_i32_1 = arith.constant 0 : i32
    return %arg0, %c0_i32, %c0_i32_0 : i32, i32, i32
  }
  func.func @transform_4(%arg0: i32) -> (i32, i32, i32) {
    %c0_i32 = arith.constant 0 : i32
    %c0_i32_0 = arith.constant 0 : i32
    %c0_i32_1 = arith.constant 0 : i32
    return %arg0, %c0_i32, %c0_i32_0 : i32, i32, i32
  }
  func.func @transform_5(%arg0: i32) -> (i32, i32, i32) {
    %c0_i32 = arith.constant 0 : i32
    %c0_i32_0 = arith.constant 0 : i32
    %c0_i32_1 = arith.constant 0 : i32
    %c0_i32_2 = arith.constant 0 : i32
    return %c0_i32, %c0_i32_0, %c0_i32_1 : i32, i32, i32
  }
  func.func @transform_6(%arg0: i32) -> (i32, i32, i32) {
    %c0_i32 = arith.constant 0 : i32
    %c0_i32_0 = arith.constant 0 : i32
    %c0_i32_1 = arith.constant 0 : i32
    %c0_i32_2 = arith.constant 0 : i32
    return %c0_i32, %c0_i32_0, %c0_i32_1 : i32, i32, i32
  }
  func.func @transform_7(%arg0: i32) -> (i32, i32, i32) {
    %c0_i32 = arith.constant 0 : i32
    %c0_i32_0 = arith.constant 0 : i32
    %c0_i32_1 = arith.constant 0 : i32
    %c0_i32_2 = arith.constant 0 : i32
    return %c0_i32, %c0_i32_0, %c0_i32_1 : i32, i32, i32
  }
  func.func @transform_8(%arg0: i32) -> (i32, i32, i32) {
    %c0_i32 = arith.constant 0 : i32
    %c0_i32_0 = arith.constant 0 : i32
    %c0_i32_1 = arith.constant 0 : i32
    %c0_i32_2 = arith.constant 0 : i32
    return %c0_i32, %c0_i32_0, %c0_i32_1 : i32, i32, i32
  }
  func.func @transform_9(%arg0: i32) -> (i32, i32) {
    %c0_i32 = arith.constant 0 : i32
    %c0_i32_0 = arith.constant 0 : i32
    %c0_i32_1 = arith.constant 0 : i32
    return %c0_i32, %c0_i32_0 : i32, i32
  }
  func.func @transform_10(%arg0: i32) -> (i32, i32) {
    %c0_i32 = arith.constant 0 : i32
    %c0_i32_0 = arith.constant 0 : i32
    %c0_i32_1 = arith.constant 0 : i32
    return %c0_i32, %c0_i32_0 : i32, i32
  }
  func.func @transform_11(%arg0: i32) -> (i32, i32) {
    %c0_i32 = arith.constant 0 : i32
    %c0_i32_0 = arith.constant 0 : i32
    %c0_i32_1 = arith.constant 0 : i32
    return %c0_i32, %c0_i32_0 : i32, i32
  }
  func.func @transform_12(%arg0: i32) -> (i32, i32) {
    %c0_i32 = arith.constant 0 : i32
    %c0_i32_0 = arith.constant 0 : i32
    %c0_i32_1 = arith.constant 0 : i32
    return %c0_i32, %c0_i32_0 : i32, i32
  }
  func.func @transform_13(%arg0: i32) -> (i32, i32, i32) {
    %c0_i32 = arith.constant 0 : i32
    %c0_i32_0 = arith.constant 0 : i32
    %c0_i32_1 = arith.constant 0 : i32
    return %arg0, %c0_i32, %c0_i32_0 : i32, i32, i32
  }
}

</mosaic_0001>

<bundles_post_ra>
// kernel: tpu_custom_call.1
= control target key start
LH: loop header
LB: loop body
LE: loop exit
PB: predicated region body
PF: predicated region fallthrough
CT: control target
= control target key end

     0   :  { %s3325_s25 = smov 0   ;;  %s3774_s0 = inlined_call_operand.vmem [shape: f32[2,8,4], index: 0, kind: input, shape index: {}]   ;;  %s3775_s1 = inlined_call_operand.vmem [shape: f32[2,8,8], index: 1, kind: input, shape index: {}]   ;;  %s3776_s2 = inlined_call_operand.vmem [shape: f32[2,64,3], index: 2, kind: input, shape index: {}]   ;;  %s3777_s3 = inlined_call_operand.vmem [shape: f32[2,3,8], index: 3, kind: input, shape index: {}]   ;;  %s3778_s4 = inlined_call_operand.vmem [shape: f32[2,1,6], index: 4, kind: input, shape index: {}]   ;;  %s3779_s5 = inlined_call_operand.vmem [shape: f32[3,4,8], index: 5, kind: input, shape index: {}]   ;;  %s3780_s6 = inlined_call_operand.vmem [shape: f32[3,1,12], index: 6, kind: input, shape index: {}]   ;;  %s3781_s7 = inlined_call_operand.vmem [shape: f32[3,3,4], index: 7, kind: input, shape index: {}]   ;;  %s3782_s8 = inlined_call_operand.vmem [shape: f32[3,1,4], index: 8, kind: input, shape index: {}]   ;;  %s3783_s9 = inlined_call_operand.vmem [shape: f32[4,5], index: 9, kind: input, shape index: {}]   ;;  %s3784_s10 = inlined_call_operand.vmem [shape: f32[21,10], index: 10, kind: input, shape index: {}]   ;;  %s3785_s11 = inlined_call_operand.vmem [shape: f32[10,1], index: 11, kind: input, shape index: {}]   ;;  %s3786_s12 = inlined_call_operand.vmem [shape: f32[1,16], index: 12, kind: input, shape index: {}]   ;;  %s3787_s13 = inlined_call_operand.vmem [shape: f32[2,1,1], index: 13, kind: output, shape index: {}]  }
   0x1 LB: > { %s2956_s26 = sadd.s32 4294967295, %s3245_s25   ;;  %p2960_p0 = scmp.ge.s32.totalorder %s3245_s25, 1  ;;  %s3245_s25 = sphi %s3325_s25, %s23_s25  }
   0x2   : > { %p422_p1 = scmp.lt.s32.totalorder %s3245_s25, 3 }
   0x4   : > { %p423_p2 = pnand %p2960_p0, %p422_p1 }
   0x5   : > { %p479_p3 = scmp.lt.s32.totalorder (!%p423_p2), %s2956_s26, 1  ;;  %s3249_s24 = smov (!%p423_p2), 4  }
   0x6   : > { %426 = sbr.rel (%p423_p2) target bundleno = 4247 (0x1097), region = 72  ;;  %s3251_s29 = smov (!%p423_p2), 124  }
   0x7   : > { %s3254_s28 = smov (!%p423_p2), 113  }
   0xb   : > { %v513_v0 = vld [vmem:[%s3779_s5] sm:$0xf]  ;;  %vm3790_vm0 = vcmask 1043456   ;;  %vm3789_vm1 = vcmask 1042432   ;;  %v3247_v1 = vmov 0.0   ;;  %vm3791_vm2 = vmmov 0  }
   0xc   : > { %3092 = vmatprep.subr.mxu0 %v3247_v1  ;;  %3094 = vmatprep.mubr.msk.f32.mxu0 %vm3791_vm2, %v3247_v1  ;;  %v598_v2 = vld [vmem:[%s3781_s7] sm:$0x7]  ;;  %s3815_s26 = smov (!%p479_p3, %s2956_s26), 1  ;;  %vm520_vm3 = vcmask 31744   ;;  %vm3788_vm4 = vcmask 23552   ;;  %v738_v27 = vlaneseq  ;;  %vm1014_vm13 = vcmask 1041409  }
   0xd   : > { %3093 = vmatpush3.msk.msra.mxu0 %vm3790_vm0, %v513_v0  ;;  %3097 = vmatprep.subr.msk.mxu1 %vm3789_vm1, %v598_v2  ;;  %s2961_s14 = sshll.u32 %s3815_s26, 3  ;;  %s3037_s15 = sshll.u32 %s3815_s26, 6  ;;  %v3402_v12 = vld [vmem:[%s3780_s6] ss:$0 sm:$0xff]  ;;  %v3250_v25 = vmov 1966171168  }
   0xe   : > { %3098 = vmatpush3.msk.msra.mxu1 %vm3789_vm1, %v598_v2  ;;  %3111 = vmatprep.subr.mxu0 %v3247_v1  ;;  %s482_s18 = scalar_lea.vmem %s3774_s0, %s2961_s14  ;;  %s491_s21 = scalar_lea.vmem %s3776_s2, %s3037_s15  ;;  %v2978_v24 = vld [vmem:[%s3782_s8] ss:$0 sm:$0xff]  ;;  %v736_v26 = vunpack.c.l.s4 %v3250_v25  ;;  %v3420_v29 = vshrl.u32 %v738_v27, 7  ;;  %vm1016_vm14 = vcmask 1042434   ;;  %vm1018_vm15 = vcmask 1043459  }
   0xf   : > { %3135 = vmatprep.subr.mxu1 %v3247_v1  ;;  %v3356_v3 = vld [vmem:[%s482_s18] sm:$0xff]  ;;  %v3365_v5 = vld [vmem:[%s491_s21 + $0x8] sm:$0xff]  ;;  %v3367_v6 = vld [vmem:[%s491_s21 + $0x10] sm:$0xff]  ;;  %s486_s16 = scalar_lea.vmem %s3775_s1, %s2961_s14  ;;  %s3252_s14 = smov 120  }
  0x10   : > { %3095 = vmatmul.mubr.msk.f32.vlgmr.msra.gmra.mxu0 %vm520_vm3, %v3356_v3  ;;  %v3363_v4 = vld [vmem:[%s491_s21] sm:$0xff]  ;;  %v3377_v7 = vld [vmem:[%s491_s21 + $0x18] sm:$0xff]  ;;  %v3385_v9 = vld [vmem:[%s491_s21 + $0x28] sm:$0xff]  ;;  %v737_v28 = vunpack.c.0.s8 %v736_v26  ;;  %v3429_v36 = vsub.s32 0, %v3420_v29  ;;  %s2965_s27 = sshll.u32 %s3815_s26, 2  ;;  %s3253_s18 = smov 123  }
  0x11   : > { %3099 = vmatprep.mubr.msk.f32.mxu1 %vm3788_vm4, %v3363_v4  ;;  %3113 = vmatprep.mubr.msk.f32.mxu0 %vm3791_vm2, %v3247_v1  ;;  %v3379_v8 = vld [vmem:[%s491_s21 + $0x20] sm:$0xff]  ;;  %v3387_v10 = vld [vmem:[%s491_s21 + $0x30] sm:$0xff]  ;;  %v3393_v11 = vld [vmem:[%s491_s21 + $0x38] sm:$0xff]  ;;  %s495_s15 = scalar_lea.vmem %s3777_s3, %s2965_s27 }
  0x12   : > { %3100 = vmatmul.mubr.msk.f32.vlgmr.msra.gmra.mxu1 %vm3788_vm4, %v3365_v5  ;;  %v3423_v30 = vsub.s32 %v737_v28, %v3420_v29 }
  0x13   : > { %3102 = vmatprep.mubr.msk.f32.mxu1 %vm3788_vm4, %v3367_v6 }
  0x16   : > { %3103 = vmatmul.mubr.msk.f32.gmra.mxu1 %vm3788_vm4, %v3377_v7 }
  0x17   : > { %3105 = vmatprep.mubr.msk.f32.mxu1 %vm3788_vm4, %v3379_v8 }
  0x1a   : > { %3106 = vmatmul.mubr.msk.f32.gmra.mxu1 %vm3788_vm4, %v3385_v9 }
  0x1b   : > { %3108 = vmatprep.mubr.msk.f32.mxu1 %vm3788_vm4, %v3387_v10 }
  0x1e   : > { %3109 = vmatmul.mubr.msk.f32.gmra.mxu1 %vm3788_vm4, %v3393_v11 }
  0x1f   : > { %3137 = vmatprep.mubr.msk.f32.mxu1 %vm3791_vm2, %v3247_v1 }
  0xd0   : > { %v594_v13 = vpop.f32.mrf.mxu0 }
  0xd1   : > { %v595_v14 = vadd.f32 %v3402_v12, %v594_v13 }
  0xd2   : > { %v3101_v15 = vpop.f32.mrf.mxu1  ;;  %v3096_v16 = vpop.f32.mrf.mxu0 }
  0xd3   : > { %823 = vrot.lane.b32.xlu0 %v595_v14, %s3249_s24  ;;  %3112 = vmatpush3.msra.mxu0 %v595_v14  ;;  %v741_v31 = vrot.slane %v595_v14, %v3423_v30  ;;  %v734_v32 = vcombine.high %v595_v14, %v595_v14 }
  0xd4   : > { %v694_v17 = vpop.f32.mrf.mxu1  ;;  %844 = vrot.lane.b32.xlu1 %v3101_v15, %s3249_s24  ;;  %3116 = vmatprep.subr.mxu0 %v3247_v1 }
  0xd5   : > { %v749_v33 = vcombine.high %v741_v31, %v741_v31  ;;  %v748_v35 = vrot.slane %v734_v32, %v3423_v30  ;;  %v757_v38 = vrot.slane %v741_v31, %v3423_v30 }
  0xd6   : > { %v3104_v18 = vpop.f32.mrf.mxu1 }
  0xd7   : > { %842 = vrot.lane.b32.xlu0 %v694_v17, %s3249_s24  ;;  %v771_v34 = vrot.slane %v749_v33, %v3423_v30  ;;  %v750_v41 = vcombine.high %v748_v35, %v748_v35  ;;  %v786_v44 = vrot.slane %v757_v38, %v3429_v36  ;;  %v779_v45 = vcombine.high %v757_v38, %v757_v38 }
  0xd8   : > { %v704_v19 = vpop.f32.mrf.mxu1  ;;  %v764_v47 = vrot.slane %v748_v35, %v3423_v30 }
  0xd9   : > { %846 = vrot.lane.b32.xlu1 %v704_v19, %s3249_s24  ;;  %v790_v40 = vrot.slane %v771_v34, %v3429_v36  ;;  %v781_v46 = vcombine.high %v771_v34, %v771_v34  ;;  %v778_v48 = vrot.slane %v750_v41, %v3423_v30  ;;  %v794_v53 = vrot.slane %v779_v45, %v3429_v36 }
  0xda   : > { %v3107_v20 = vpop.f32.mrf.mxu1  ;;  %v780_v57 = vcombine.high %v764_v47, %v764_v47  ;;  %v802_v63 = vrot.slane %v764_v47, %v3429_v36 }
  0xdb   : > { %848 = vrot.lane.b32.xlu0 %v3104_v18, %s3249_s24  ;;  %v798_v55 = vrot.slane %v781_v46, %v3429_v36  ;;  %v806_v56 = vrot.slane %v778_v48, %v3429_v36  ;;  %v782_v58 = vcombine.high %v778_v48, %v778_v48 }
  0xdc   : > { %v714_v21 = vpop.f32.mrf.mxu1  ;;  %v810_v16 = vrot.slane %v780_v57, %v3429_v36 }
  0xdd   : > { %850 = vrot.lane.b32.xlu1 %v714_v21, %s3249_s24  ;;  %v814_v17 = vrot.slane %v782_v58, %v3429_v36 }
  0xde   : > { %v3110_v22 = vpop.f32.mrf.mxu1 }
  0xdf   : > { %852 = vrot.lane.b32.xlu0 %v3107_v20, %s3249_s24 }
  0xe0   : > { %v724_v23 = vpop.f32.mrf.mxu1 }
  0xe1   : > { %854 = vrot.lane.b32.xlu1 %v724_v23, %s3249_s24 }
  0xe3   : > { %904 = vrot.lane.b32.xlu0 %v2978_v24, %s3249_s24 }
  0xe5   : > { %856 = vrot.lane.b32.xlu1 %v3110_v22, %s3249_s24 }
 0x145   : > { %v824_v37 = vpop.permute.xlu0 %823 }
 0x146   : > { %v845_v39 = vpop.permute.xlu1 %844  ;;  %v827_v42 = vadd.f32 %v824_v37, %v790_v40  ;;  %v826_v49 = vadd.f32 %v824_v37, %v786_v44  ;;  %v828_v59 = vadd.f32 %v824_v37, %v794_v53  ;;  %v829_v60 = vadd.f32 %v824_v37, %v798_v55 }
 0x147   : > { %v831_v0 = vadd.f32 %v824_v37, %v806_v56  ;;  %v830_v18 = vadd.f32 %v824_v37, %v802_v63  ;;  %v832_v21 = vadd.f32 %v824_v37, %v810_v16  ;;  %v833_v22 = vadd.f32 %v824_v37, %v814_v17 }
 0x148   : > { %v867_v51 = vadd.f32 %v845_v39, %v827_v42  ;;  %v981_v17 = vand.u32 127, %v738_v27 }
 0x149   : > { %v843_v43 = vpop.permute.xlu0 %842 }
 0x14a   : > { %v866_v52 = vadd.f32 %v843_v43, %v826_v49  ;;  %v883_v62 = vmul.f32 0.2, %v867_v51  ;;  %vm875_vm5 = vcmp.ge.f32.partialorder %v867_v51, 0.0 }
 0x14b   : > { %v847_v50 = vpop.permute.xlu1 %846 }
 0x14c   : > { %v882_v2 = vmul.f32 0.2, %v866_v52  ;;  %v868_v13 = vadd.f32 %v847_v50, %v828_v59  ;;  %vm874_vm6 = vcmp.ge.f32.partialorder %v866_v52, 0.0  ;;  %v891_v23 = vsel %vm875_vm5, %v867_v51, %v883_v62 }
 0x14d   : > { %v849_v54 = vpop.permute.xlu0 %848  ;;  %vm1020_vm5 = vcmask 1044484  }
 0x14e   : > { %v869_v14 = vadd.f32 %v849_v54, %v829_v60  ;;  %v884_v24 = vmul.f32 0.2, %v868_v13  ;;  %v890_v31 = vsel %vm874_vm6, %v866_v52, %v882_v2  ;;  %vm876_vm7 = vcmp.ge.f32.partialorder %v868_v13, 0.0 }
 0x14f   : > { %v851_v61 = vpop.permute.xlu1 %850  ;;  %vm1022_vm6 = vcmask 1045509  }
 0x150   : > { %v885_v25 = vmul.f32 0.2, %v869_v14  ;;  %v870_v26 = vadd.f32 %v851_v61, %v830_v18  ;;  %vm877_vm8 = vcmp.ge.f32.partialorder %v869_v14, 0.0  ;;  %v892_v40 = vsel %vm876_vm7, %v868_v13, %v884_v24 }
 0x151   : > { %v853_v15 = vpop.permute.xlu0 %852  ;;  %vm1024_vm7 = vcmask 1046534  }
 0x152   : > { %v871_v19 = vadd.f32 %v853_v15, %v831_v0  ;;  %v886_v37 = vmul.f32 0.2, %v870_v26  ;;  %v893_v41 = vsel %vm877_vm8, %v869_v14, %v885_v25  ;;  %vm878_vm10 = vcmp.ge.f32.partialorder %v870_v26, 0.0 }
 0x153   : > { %v855_v20 = vpop.permute.xlu1 %854  ;;  %vm1026_vm8 = vcmask 1047559  }
 0x154   : > { %v887_v34 = vmul.f32 0.2, %v871_v19  ;;  %v872_v35 = vadd.f32 %v855_v20, %v832_v21  ;;  %vm879_vm9 = vcmp.ge.f32.partialorder %v871_v19, 0.0  ;;  %v894_v47 = vsel %vm878_vm10, %v870_v26, %v886_v37 }
 0x155   : > { %v905_v28 = vpop.permute.xlu0 %904  ;;  %vm3793_vm10 = vcmask 64512  }
 0x156   : > { %v907_v32 = vmul.f32 %v905_v28, %v890_v31  ;;  %v908_v33 = vmul.f32 %v905_v28, %v891_v23  ;;  %v909_v42 = vmul.f32 %v905_v28, %v892_v40  ;;  %v910_v43 = vmul.f32 %v905_v28, %v893_v41 }
 0x157   : > { %v857_v38 = vpop.permute.xlu1 %856  ;;  %v888_v44 = vmul.f32 0.2, %v872_v35  ;;  %v895_v46 = vsel %vm879_vm9, %v871_v19, %v887_v34  ;;  %vm880_vm11 = vcmp.ge.f32.partialorder %v872_v35, 0.0  ;;  %v911_v48 = vmul.f32 %v905_v28, %v894_v47 }
 0x158   : > { %v873_v39 = vadd.f32 %v857_v38, %v833_v22  ;;  %923 = vrot.lane.b32.xlu0 %v907_v32, %s3251_s29  ;;  %925 = vrot.lane.b32.xlu1 %v908_v33, %s3251_s29  ;;  %v912_v49 = vmul.f32 %v905_v28, %v895_v46  ;;  %v3460_v19 = vsub.s32 %v981_v17, %v3420_v29 }
 0x159   : > { %v896_v50 = vsel %vm880_vm11, %v872_v35, %v888_v44 }
 0x15a   : > { %v889_v45 = vmul.f32 0.2, %v873_v39  ;;  %vm881_vm12 = vcmp.ge.f32.partialorder %v873_v39, 0.0  ;;  %v913_v52 = vmul.f32 %v905_v28, %v896_v50 }
 0x15c   : > { %927 = vrot.lane.b32.xlu0 %v909_v42, %s3251_s29  ;;  %929 = vrot.lane.b32.xlu1 %v910_v43, %s3251_s29  ;;  %v897_v51 = vsel %vm881_vm12, %v873_v39, %v889_v45  ;;  %v3477_v39 = vld [vmem:[%s486_s16] sm:$0xff]  ;;  %s501_s16 = scalar_lea.vmem %s3787_s13, %s3815_s26 }
 0x15d   : > { %v914_v53 = vmul.f32 %v905_v28, %v897_v51  ;;  %vm3794_vm9 = vcmp.gt.f32.partialorder %v3477_v39, 0.0 }
 0x160   : > { %931 = vrot.lane.b32.xlu0 %v911_v48, %s3251_s29  ;;  %933 = vrot.lane.b32.xlu1 %v912_v49, %s3251_s29 }
 0x164   : > { %935 = vrot.lane.b32.xlu0 %v913_v52, %s3251_s29  ;;  %937 = vrot.lane.b32.xlu1 %v914_v53, %s3251_s29 }
 0x1ca   : > { %v924_v54 = vpop.permute.xlu0 %923  ;;  %v926_v55 = vpop.permute.xlu1 %925 }
 0x1cb   : > { %v947_v56 = vsel %vm520_vm3, %v924_v54, 0.0  ;;  %v950_v57 = vsel %vm520_vm3, %v926_v55, 0.0 }
 0x1cc   : > { %948 = vadd.xlane.f32.xlu0 %v947_v56  ;;  %951 = vadd.xlane.f32.xlu1 %v950_v57  ;;  %v2982_v56 = vld [vmem:[%s3779_s5 + $0x4] sm:$0xf] }
 0x1cd   : > { %v2986_v57 = vld [vmem:[%s3781_s7 + $0x4] sm:$0x7] }
 0x1ce   : > { %v928_v58 = vpop.permute.xlu0 %927  ;;  %v930_v59 = vpop.permute.xlu1 %929 }
 0x1cf   : > { %v956_v60 = vsel %vm520_vm3, %v930_v59, 0.0  ;;  %v953_v63 = vsel %vm520_vm3, %v928_v58, 0.0 }
 0x1d0   : > { %957 = vadd.xlane.f32.xlu0 %v956_v60 }
 0x1d2   : > { %v932_v61 = vpop.permute.xlu0 %931  ;;  %v934_v62 = vpop.permute.xlu1 %933 }
 0x1d3   : > { %v959_v0 = vsel %vm520_vm3, %v932_v61, 0.0  ;;  %v962_v13 = vsel %vm520_vm3, %v934_v62, 0.0 }
 0x1d4   : > { %954 = vadd.xlane.f32.xlu0 %v953_v63  ;;  %960 = vadd.xlane.f32.xlu1 %v959_v0 }
 0x1d6   : > { %v936_v2 = vpop.permute.xlu0 %935  ;;  %v938_v15 = vpop.permute.xlu1 %937 }
 0x1d7   : > { %v965_v14 = vsel %vm520_vm3, %v936_v2, 0.0  ;;  %v968_v16 = vsel %vm520_vm3, %v938_v15, 0.0 }
 0x1d8   : > { %963 = vadd.xlane.f32.xlu0 %v962_v13  ;;  %966 = vadd.xlane.f32.xlu1 %v965_v14 }
 0x1dc   : > { %969 = vadd.xlane.f32.xlu0 %v968_v16 }
 0x255   : > { %v949_v18 = vpop.xlane.xlu0 %948  ;;  %v952_v20 = vpop.xlane.xlu1 %951 }
 0x256   : > { %v985_v22 = vrot.slane %v949_v18, %v3460_v19  ;;  %v989_v23 = vrot.slane %v952_v20, %v3460_v19 }
 0x258   : > { %v1015_v27 = vsel %vm1014_vm13, %v989_v23, %v985_v22 }
 0x259   : > { %v958_v21 = vpop.xlane.xlu0 %957 }
 0x25a   : > { %v997_v28 = vrot.slane %v958_v21, %v3460_v19 }
 0x25d   : > { %v955_v24 = vpop.xlane.xlu0 %954  ;;  %v961_v25 = vpop.xlane.xlu1 %960 }
 0x25e   : > { %v993_v26 = vrot.slane %v955_v24, %v3460_v19  ;;  %v1001_v31 = vrot.slane %v961_v25, %v3460_v19 }
 0x260   : > { %v1017_v29 = vsel %vm1016_vm14, %v993_v26, %v1015_v27  ;;  %v2997_v26 = vld [vmem:[%s3782_s8 + $0x1] ss:$0 sm:$0xff] }
 0x261   : > { %v1019_v32 = vsel %vm1018_vm15, %v997_v28, %v1017_v29  ;;  %v964_v33 = vpop.xlane.xlu0 %963  ;;  %v967_v34 = vpop.xlane.xlu1 %966 }
 0x262   : > { %v1021_v35 = vsel %vm1020_vm5, %v1001_v31, %v1019_v32  ;;  %v1005_v38 = vrot.slane %v964_v33, %v3460_v19  ;;  %v1009_v37 = vrot.slane %v967_v34, %v3460_v19 }
 0x264   : > { %v1023_v40 = vsel %vm1022_vm6, %v1005_v38, %v1021_v35 }
 0x265   : > { %v970_v41 = vpop.xlane.xlu0 %969  ;;  %v1025_v43 = vsel %vm1024_vm7, %v1009_v37, %v1023_v40 }
 0x266   : > { %v1013_v42 = vrot.slane %v970_v41, %v3460_v19 }
 0x268   : > { %v1027_v44 = vsel %vm1026_vm8, %v1013_v42, %v1025_v43 }
 0x269   : > { %v1029_v45 = vsel %vm3794_vm9, %v1027_v44, -1e+30 }
 0x26a   : > { %v1031_v46 = vsel %vm3793_vm10, %v1029_v45, -inf }
 0x26b   : > { %1032 = vmax.xlane.f32.xlu1 %v1031_v46 }
 0x27c   : > { %1043 = vrot.lane.b32.xlu1 %v3402_v12, %s3252_s14 }
 0x2f4   : > { %v1033_v47 = vpop.xlane.xlu1 %1032 }
 0x2f5   : > { %v1034_v48 = vsub.f32 %v1029_v45, %v1033_v47 }
 0x2f7   : > { %v1035_v49 = vmul.f32 1.442695, %v1034_v48 }
 0x2f8   : > { %v1044_v12 = vpop.permute.xlu1 %1043 }
 0x2f9   : > { %3217 = vpow2.f32 %v1035_v49 }
 0x306   : > { %v3218_v50 = vpop.eup %3217 }
 0x307   : > { %v1037_v51 = vmul.f32 %v3218_v50, %v3477_v39 }
 0x309   : > { %v1038_v52 = vsel %vm3793_vm10, %v1037_v51, 0.0 }
 0x30a   : > { %1039 = vadd.xlane.f32.xlu0 %v1038_v52 }
 0x393   : > { %v1040_v53 = vpop.xlane.xlu0 %1039 }
 0x394   : > { %3219 = vrcp.f32 %v1040_v53 }
 0x3a1   : > { %v3220_v54 = vpop.eup %3219 }
 0x3a2   : > { %v1042_v55 = vmul.f32 %v3220_v54, %v1037_v51 }
 0x3a4   : > { %3114 = vmatmul.mubr.msk.f32.vlgmr.msra.gmra.mxu0 %vm3793_vm10, %v1042_v55 }
 0x3a5   : > { %3118 = vmatprep.mubr.msk.f32.mxu0 %vm3791_vm2, %v3247_v1  ;;  %3117 = vmatpush3.msk.msra.mxu0 %vm3790_vm0, %v2982_v56 }
 0x3a6   : > { %3121 = vmatprep.subr.msk.mxu0 %vm3789_vm1, %v2986_v57 }
 0x464   : > { %v1115_v58 = vpop.f32.mrf.mxu0 }
 0x465   : > { %v1116_v59 = vadd.f32 %v1115_v58, %v1044_v12 }
 0x466   : > { %v3115_v60 = vpop.f32.mrf.mxu0 }
 0x467   : > { %v1120_v61 = vmin.f32 %v1116_v59, 0.0  ;;  %vm1119_vm11 = vcmp.gt.f32.partialorder %v1116_v59, 0.0 }
 0x469   : > { %v1121_v62 = vmul.f32 1.442695, %v1120_v61 }
 0x46b   : > { %3221 = vpow2.f32 %v1121_v62 }
 0x478   : > { %v3222_v63 = vpop.eup %3221 }
 0x479   : > { %v2980_v0 = vadd.f32 -1.0, %v3222_v63 }
 0x47b   : > { %v1124_v2 = vsel %vm1119_vm11, %v1116_v59, %v2980_v0 }
 0x47c   : > { %v3504_v13 = vadd.f32 %v1124_v2, %v3356_v3  ;;  %v3531_v3 = vld [vmem:[%s3780_s6 + $0x1] ss:$0 sm:$0xff] }
 0x47e   : > { %3119 = vmatmul.mubr.msk.f32.vlgmr.msra.gmra.mxu0 %vm520_vm3, %v3504_v13 }
 0x47f   : > { %3122 = vmatpush3.msk.msra.mxu0 %vm3789_vm1, %v2986_v57  ;;  %3123 = vmatprep.mubr.msk.f32.mxu0 %vm3788_vm4, %v3363_v4 }
 0x480   : > { %3159 = vmatprep.subr.mxu0 %v3247_v1 }
 0x482   : > { %3124 = vmatmul.mubr.msk.f32.vlgmr.msra.gmra.mxu0 %vm3788_vm4, %v3365_v5 }
 0x483   : > { %3126 = vmatprep.mubr.msk.f32.mxu0 %vm3788_vm4, %v3367_v6 }
 0x486   : > { %3127 = vmatmul.mubr.msk.f32.gmra.mxu0 %vm3788_vm4, %v3377_v7 }
 0x487   : > { %3129 = vmatprep.mubr.msk.f32.mxu0 %vm3788_vm4, %v3379_v8 }
 0x48a   : > { %3130 = vmatmul.mubr.msk.f32.gmra.mxu0 %vm3788_vm4, %v3385_v9 }
 0x48b   : > { %3132 = vmatprep.mubr.msk.f32.mxu0 %vm3788_vm4, %v3387_v10 }
 0x48e   : > { %3133 = vmatmul.mubr.msk.f32.gmra.mxu0 %vm3788_vm4, %v3393_v11 }
 0x48f   : > { %3161 = vmatprep.mubr.msk.f32.mxu0 %vm3791_vm2, %v3247_v1 }
 0x53e   : > { %v1208_v14 = vpop.f32.mrf.mxu0 }
 0x53f   : > { %v1209_v15 = vadd.f32 %v3531_v3, %v1208_v14 }
 0x540   : > { %v3120_v16 = vpop.f32.mrf.mxu0 }
 0x541   : > { %1412 = vrot.lane.b32.xlu0 %v1209_v15, %s3249_s24  ;;  %3136 = vmatpush3.msra.mxu1 %v1209_v15  ;;  %v1330_v27 = vrot.slane %v1209_v15, %v3423_v30  ;;  %v1323_v28 = vcombine.high %v1209_v15, %v1209_v15 }
 0x542   : > { %v3125_v17 = vpop.f32.mrf.mxu0  ;;  %3140 = vmatprep.subr.mxu1 %v3247_v1 }
 0x543   : > { %1433 = vrot.lane.b32.xlu1 %v3125_v17, %s3249_s24  ;;  %v1338_v29 = vcombine.high %v1330_v27, %v1330_v27  ;;  %v1337_v31 = vrot.slane %v1323_v28, %v3423_v30  ;;  %v1346_v34 = vrot.slane %v1330_v27, %v3423_v30 }
 0x544   : > { %v1283_v18 = vpop.f32.mrf.mxu0 }
 0x545   : > { %v1360_v32 = vrot.slane %v1338_v29, %v3423_v30  ;;  %v1339_v38 = vcombine.high %v1337_v31, %v1337_v31  ;;  %v1375_v41 = vrot.slane %v1346_v34, %v3429_v36  ;;  %v1368_v43 = vcombine.high %v1346_v34, %v1346_v34 }
 0x546   : > { %v3128_v20 = vpop.f32.mrf.mxu0  ;;  %v1353_v45 = vrot.slane %v1337_v31, %v3423_v30 }
 0x547   : > { %1431 = vrot.lane.b32.xlu1 %v1283_v18, %s3249_s24  ;;  %v1379_v37 = vrot.slane %v1360_v32, %v3429_v36  ;;  %v1370_v44 = vcombine.high %v1360_v32, %v1360_v32  ;;  %v1367_v46 = vrot.slane %v1339_v38, %v3423_v30  ;;  %v1383_v51 = vrot.slane %v1368_v43, %v3429_v36 }
 0x548   : > { %v1293_v21 = vpop.f32.mrf.mxu0  ;;  %v1391_v54 = vrot.slane %v1353_v45, %v3429_v36  ;;  %v1369_v56 = vcombine.high %v1353_v45, %v1353_v45 }
 0x549   : > { %1435 = vrot.lane.b32.xlu0 %v1293_v21, %s3249_s24  ;;  %v1387_v52 = vrot.slane %v1370_v44, %v3429_v36  ;;  %v1395_v55 = vrot.slane %v1367_v46, %v3429_v36  ;;  %v1371_v57 = vcombine.high %v1367_v46, %v1367_v46 }
 0x54a   : > { %v3131_v22 = vpop.f32.mrf.mxu0  ;;  %v1399_v15 = vrot.slane %v1369_v56, %v3429_v36 }
 0x54b   : > { %1437 = vrot.lane.b32.xlu1 %v3128_v20, %s3249_s24  ;;  %v1403_v16 = vrot.slane %v1371_v57, %v3429_v36 }
 0x54c   : > { %v1303_v23 = vpop.f32.mrf.mxu0 }
 0x54d   : > { %1439 = vrot.lane.b32.xlu0 %v1303_v23, %s3249_s24 }
 0x54e   : > { %v3134_v24 = vpop.f32.mrf.mxu0 }
 0x54f   : > { %1441 = vrot.lane.b32.xlu1 %v3131_v22, %s3249_s24 }
 0x550   : > { %v1313_v25 = vpop.f32.mrf.mxu0 }
 0x551   : > { %1443 = vrot.lane.b32.xlu0 %v1313_v25, %s3249_s24 }
 0x553   : > { %1494 = vrot.lane.b32.xlu1 %v2997_v26, %s3249_s24 }
 0x555   : > { %1445 = vrot.lane.b32.xlu0 %v3134_v24, %s3249_s24 }
 0x5b3   : > { %v1413_v35 = vpop.permute.xlu0 %1412 }
 0x5b4   : > { %v1416_v40 = vadd.f32 %v1413_v35, %v1379_v37  ;;  %v1415_v47 = vadd.f32 %v1413_v35, %v1375_v41  ;;  %v1417_v12 = vadd.f32 %v1413_v35, %v1383_v51  ;;  %v1418_v58 = vadd.f32 %v1413_v35, %v1387_v52 }
 0x5b5   : > { %v1434_v33 = vpop.permute.xlu1 %1433  ;;  %v1419_v60 = vadd.f32 %v1413_v35, %v1391_v54  ;;  %v1420_v61 = vadd.f32 %v1413_v35, %v1395_v55  ;;  %v1421_v21 = vadd.f32 %v1413_v35, %v1399_v15  ;;  %v1422_v22 = vadd.f32 %v1413_v35, %v1403_v16 }
 0x5b6   : > { %v1456_v49 = vadd.f32 %v1434_v33, %v1416_v40 }
 0x5b8   : > { %v1472_v62 = vmul.f32 0.2, %v1456_v49  ;;  %vm1464_vm12 = vcmp.ge.f32.partialorder %v1456_v49, 0.0 }
 0x5b9   : > { %v1432_v42 = vpop.permute.xlu1 %1431 }
 0x5ba   : > { %v1455_v50 = vadd.f32 %v1432_v42, %v1415_v47  ;;  %v1480_v27 = vsel %vm1464_vm12, %v1456_v49, %v1472_v62 }
 0x5bb   : > { %v1436_v48 = vpop.permute.xlu0 %1435 }
 0x5bc   : > { %v1471_v63 = vmul.f32 0.2, %v1455_v50  ;;  %v1457_v0 = vadd.f32 %v1436_v48, %v1417_v12  ;;  %vm1463_vm11 = vcmp.ge.f32.partialorder %v1455_v50, 0.0 }
 0x5bd   : > { %v1438_v53 = vpop.permute.xlu1 %1437 }
 0x5be   : > { %v1458_v2 = vadd.f32 %v1438_v53, %v1418_v58  ;;  %v1473_v23 = vmul.f32 0.2, %v1457_v0  ;;  %v1479_v26 = vsel %vm1463_vm11, %v1455_v50, %v1471_v63  ;;  %vm1465_vm4 = vcmp.ge.f32.partialorder %v1457_v0, 0.0 }
 0x5bf   : > { %v1440_v59 = vpop.permute.xlu0 %1439 }
 0x5c0   : > { %v1459_v17 = vadd.f32 %v1440_v59, %v1419_v60  ;;  %v1474_v24 = vmul.f32 0.2, %v1458_v2  ;;  %vm1466_vm1 = vcmp.ge.f32.partialorder %v1458_v2, 0.0  ;;  %v1481_v35 = vsel %vm1465_vm4, %v1457_v0, %v1473_v23 }
 0x5c1   : > { %v1442_v14 = vpop.permute.xlu1 %1441 }
 0x5c2   : > { %v1460_v18 = vadd.f32 %v1442_v14, %v1420_v61  ;;  %v1475_v31 = vmul.f32 0.2, %v1459_v17  ;;  %vm1467_vm0 = vcmp.ge.f32.partialorder %v1459_v17, 0.0  ;;  %v1482_v37 = vsel %vm1466_vm1, %v1458_v2, %v1474_v24 }
 0x5c3   : > { %v1444_v20 = vpop.permute.xlu0 %1443  ;;  %vm3796_vm1 = vcmask 1043456  }
 0x5c4   : > { %v1476_v32 = vmul.f32 0.2, %v1460_v18  ;;  %v1461_v33 = vadd.f32 %v1444_v20, %v1421_v21  ;;  %vm1468_vm2 = vcmp.ge.f32.partialorder %v1460_v18, 0.0  ;;  %v1483_v44 = vsel %vm1467_vm0, %v1459_v17, %v1475_v31 }
 0x5c5   : > { %v1495_v25 = vpop.permute.xlu1 %1494  ;;  %vm3795_vm0 = vmmov 0  }
 0x5c6   : > { %v1497_v28 = vmul.f32 %v1495_v25, %v1479_v26  ;;  %v1498_v29 = vmul.f32 %v1495_v25, %v1480_v27  ;;  %v1499_v40 = vmul.f32 %v1495_v25, %v1481_v35  ;;  %v1500_v41 = vmul.f32 %v1495_v25, %v1482_v37 }
 0x5c7   : > { %v1446_v34 = vpop.permute.xlu0 %1445  ;;  %v1477_v42 = vmul.f32 0.2, %v1461_v33  ;;  %v1484_v45 = vsel %vm1468_vm2, %v1460_v18, %v1476_v32  ;;  %vm1469_vm12 = vcmp.ge.f32.partialorder %v1461_v33, 0.0  ;;  %v1501_v46 = vmul.f32 %v1495_v25, %v1483_v44 }
 0x5c8   : > { %v1462_v38 = vadd.f32 %v1446_v34, %v1422_v22  ;;  %1513 = vrot.lane.b32.xlu1 %v1497_v28, %s3251_s29  ;;  %1515 = vrot.lane.b32.xlu0 %v1498_v29, %s3251_s29  ;;  %v1502_v47 = vmul.f32 %v1495_v25, %v1484_v45  ;;  %vm3797_vm2 = vcmask 1042432  }
 0x5c9   : > { %v1485_v48 = vsel %vm1469_vm12, %v1461_v33, %v1477_v42  ;;  %vm3798_vm12 = vmmov %vm3797_vm2 }
 0x5ca   : > { %v1478_v43 = vmul.f32 0.2, %v1462_v38  ;;  %vm1470_vm11 = vcmp.ge.f32.partialorder %v1462_v38, 0.0  ;;  %v1503_v50 = vmul.f32 %v1495_v25, %v1485_v48 }
 0x5cc   : > { %1517 = vrot.lane.b32.xlu1 %v1499_v40, %s3251_s29  ;;  %1519 = vrot.lane.b32.xlu0 %v1500_v41, %s3251_s29  ;;  %v1486_v49 = vsel %vm1470_vm11, %v1462_v38, %v1478_v43  ;;  %vm3799_vm11 = vcmask 23552  }
 0x5cd   : > { %v1504_v51 = vmul.f32 %v1495_v25, %v1486_v49 }
 0x5d0   : > { %1521 = vrot.lane.b32.xlu1 %v1501_v46, %s3251_s29  ;;  %1523 = vrot.lane.b32.xlu0 %v1502_v47, %s3251_s29 }
 0x5d4   : > { %1525 = vrot.lane.b32.xlu1 %v1503_v50, %s3251_s29  ;;  %1527 = vrot.lane.b32.xlu0 %v1504_v51, %s3251_s29 }
 0x63a   : > { %v1514_v52 = vpop.permute.xlu1 %1513  ;;  %v1516_v53 = vpop.permute.xlu0 %1515 }
 0x63b   : > { %v1537_v54 = vsel %vm520_vm3, %v1514_v52, 0.0  ;;  %v1540_v55 = vsel %vm520_vm3, %v1516_v53, 0.0  ;;  %v3005_v53 = vld [vmem:[%s3781_s7 + $0x8] sm:$0x7] }
 0x63c   : > { %1538 = vadd.xlane.f32.xlu1 %v1537_v54  ;;  %1541 = vadd.xlane.f32.xlu0 %v1540_v55 }
 0x63e   : > { %v1518_v56 = vpop.permute.xlu1 %1517  ;;  %v1520_v57 = vpop.permute.xlu0 %1519 }
 0x63f   : > { %v1543_v12 = vsel %vm520_vm3, %v1518_v56, 0.0  ;;  %v1546_v58 = vsel %vm520_vm3, %v1520_v57, 0.0 }
 0x640   : > { %1544 = vadd.xlane.f32.xlu0 %v1543_v12  ;;  %1547 = vadd.xlane.f32.xlu1 %v1546_v58 }
 0x642   : > { %v1522_v59 = vpop.permute.xlu1 %1521  ;;  %v1524_v60 = vpop.permute.xlu0 %1523 }
 0x643   : > { %v1549_v61 = vsel %vm520_vm3, %v1522_v59, 0.0  ;;  %v1552_v62 = vsel %vm520_vm3, %v1524_v60, 0.0 }
 0x644   : > { %1550 = vadd.xlane.f32.xlu0 %v1549_v61  ;;  %1553 = vadd.xlane.f32.xlu1 %v1552_v62 }
 0x646   : > { %v1526_v63 = vpop.permute.xlu1 %1525  ;;  %v1528_v0 = vpop.permute.xlu0 %1527 }
 0x647   : > { %v1555_v2 = vsel %vm520_vm3, %v1526_v63, 0.0  ;;  %v1558_v14 = vsel %vm520_vm3, %v1528_v0, 0.0  ;;  %v3016_v0 = vld [vmem:[%s3782_s8 + $0x2] ss:$0 sm:$0xff] }
 0x648   : > { %1556 = vadd.xlane.f32.xlu0 %v1555_v2  ;;  %1559 = vadd.xlane.f32.xlu1 %v1558_v14 }
 0x6c5   : > { %v1539_v15 = vpop.xlane.xlu1 %1538  ;;  %v1542_v16 = vpop.xlane.xlu0 %1541 }
 0x6c6   : > { %v1572_v17 = vrot.slane %v1539_v15, %v3460_v19  ;;  %v1576_v18 = vrot.slane %v1542_v16, %v3460_v19 }
 0x6c8   : > { %v1601_v23 = vsel %vm1014_vm13, %v1576_v18, %v1572_v17 }
 0x6c9   : > { %v1548_v20 = vpop.xlane.xlu1 %1547  ;;  %v1545_v21 = vpop.xlane.xlu0 %1544 }
 0x6ca   : > { %v1580_v22 = vrot.slane %v1545_v21, %v3460_v19  ;;  %v1584_v24 = vrot.slane %v1548_v20, %v3460_v19 }
 0x6cc   : > { %v1602_v25 = vsel %vm1016_vm14, %v1580_v22, %v1601_v23 }
 0x6cd   : > { %v1554_v26 = vpop.xlane.xlu1 %1553  ;;  %v1551_v27 = vpop.xlane.xlu0 %1550  ;;  %v1603_v31 = vsel %vm1018_vm15, %v1584_v24, %v1602_v25 }
 0x6ce   : > { %v1588_v28 = vrot.slane %v1551_v27, %v3460_v19  ;;  %v1592_v29 = vrot.slane %v1554_v26, %v3460_v19 }
 0x6d0   : > { %v1604_v32 = vsel %vm1020_vm5, %v1588_v28, %v1603_v31 }
 0x6d1   : > { %v1560_v33 = vpop.xlane.xlu1 %1559  ;;  %v1557_v34 = vpop.xlane.xlu0 %1556  ;;  %v1605_v37 = vsel %vm1022_vm6, %v1592_v29, %v1604_v32 }
 0x6d2   : > { %v1600_v38 = vrot.slane %v1560_v33, %v3460_v19  ;;  %v1596_v35 = vrot.slane %v1557_v34, %v3460_v19 }
 0x6d4   : > { %v1606_v40 = vsel %vm1024_vm7, %v1596_v35, %v1605_v37 }
 0x6d5   : > { %v1607_v41 = vsel %vm1026_vm8, %v1600_v38, %v1606_v40 }
 0x6d6   : > { %v1609_v42 = vsel %vm3794_vm9, %v1607_v41, -1e+30 }
 0x6d7   : > { %v1610_v43 = vsel %vm3793_vm10, %v1609_v42, -inf }
 0x6d8   : > { %1611 = vmax.xlane.f32.xlu0 %v1610_v43 }
 0x6ee   : > { %1622 = vrot.lane.b32.xlu0 %v3531_v3, %s3252_s14  ;;  %v3001_v3 = vld [vmem:[%s3779_s5 + $0x8] sm:$0xf] }
 0x761   : > { %v1612_v44 = vpop.xlane.xlu0 %1611 }
 0x762   : > { %v1613_v45 = vsub.f32 %v1609_v42, %v1612_v44 }
 0x764   : > { %v1614_v46 = vmul.f32 1.442695, %v1613_v45 }
 0x765   : > { %v1623_v54 = vpop.permute.xlu0 %1622 }
 0x766   : > { %3223 = vpow2.f32 %v1614_v46 }
 0x773   : > { %v3224_v47 = vpop.eup %3223 }
 0x774   : > { %v1616_v48 = vmul.f32 %v3224_v47, %v3477_v39 }
 0x776   : > { %v1617_v49 = vsel %vm3793_vm10, %v1616_v48, 0.0 }
 0x777   : > { %1618 = vadd.xlane.f32.xlu1 %v1617_v49 }
 0x800   : > { %v1619_v50 = vpop.xlane.xlu1 %1618 }
 0x801   : > { %3225 = vrcp.f32 %v1619_v50 }
 0x80e   : > { %v3226_v51 = vpop.eup %3225 }
 0x80f   : > { %v1621_v52 = vmul.f32 %v3226_v51, %v1616_v48 }
 0x811   : > { %3138 = vmatmul.mubr.msk.f32.vlgmr.msra.gmra.mxu1 %vm3793_vm10, %v1621_v52 }
 0x812   : > { %3142 = vmatprep.mubr.msk.f32.mxu1 %vm3795_vm0, %v3247_v1  ;;  %3141 = vmatpush3.msk.msra.mxu1 %vm3796_vm1, %v3001_v3  ;;  %vm3800_vm1 = vmmov %vm3799_vm11 }
 0x813   : > { %3145 = vmatprep.subr.msk.mxu1 %vm3797_vm2, %v3005_v53  ;;  %vm3801_vm2 = vmmov %vm3800_vm1 }
 0x814   : > { %vm3803_vm10 = vmmov %vm3800_vm1 }
 0x815   : > { %vm3804_vm9 = vmmov %vm3800_vm1 }
 0x8d1   : > { %v1694_v55 = vpop.f32.mrf.mxu1 }
 0x8d2   : > { %v1695_v56 = vadd.f32 %v1694_v55, %v1623_v54 }
 0x8d3   : > { %v3139_v57 = vpop.f32.mrf.mxu1 }
 0x8d4   : > { %v1699_v12 = vmin.f32 %v1695_v56, 0.0  ;;  %vm1698_vm4 = vcmp.gt.f32.partialorder %v1695_v56, 0.0 }
 0x8d6   : > { %v1700_v58 = vmul.f32 1.442695, %v1699_v12 }
 0x8d8   : > { %3227 = vpow2.f32 %v1700_v58 }
 0x8e5   : > { %v3228_v59 = vpop.eup %3227 }
 0x8e6   : > { %v2999_v60 = vadd.f32 -1.0, %v3228_v59 }
 0x8e8   : > { %v1703_v61 = vsel %vm1698_vm4, %v1695_v56, %v2999_v60  ;;  %vm3802_vm4 = vmmov %vm3800_vm1 }
 0x8e9   : > { %v3612_v62 = vadd.f32 %v1703_v61, %v3504_v13 }
 0x8eb   : > { %3143 = vmatmul.mubr.msk.f32.vlgmr.msra.gmra.mxu1 %vm520_vm3, %v3612_v62 }
 0x8ec   : > { %3146 = vmatpush3.msk.msra.mxu1 %vm3798_vm12, %v3005_v53  ;;  %3147 = vmatprep.mubr.msk.f32.mxu1 %vm3799_vm11, %v3363_v4  ;;  %vm3805_vm12 = vmmov %vm3800_vm1  ;;  %v3639_v4 = vld [vmem:[%s3780_s6 + $0x2] ss:$0 sm:$0xff] }
 0x8ed   : > { %3179 = vmatprep.subr.mxu1 %v3247_v1  ;;  %vm3806_vm11 = vmmov %vm3800_vm1 }
 0x8ef   : > { %3148 = vmatmul.mubr.msk.f32.vlgmr.msra.gmra.mxu1 %vm3800_vm1, %v3365_v5 }
 0x8f0   : > { %3150 = vmatprep.mubr.msk.f32.mxu1 %vm3801_vm2, %v3367_v6 }
 0x8f3   : > { %3151 = vmatmul.mubr.msk.f32.gmra.mxu1 %vm3802_vm4, %v3377_v7 }
 0x8f4   : > { %3153 = vmatprep.mubr.msk.f32.mxu1 %vm3803_vm10, %v3379_v8 }
 0x8f7   : > { %3154 = vmatmul.mubr.msk.f32.gmra.mxu1 %vm3804_vm9, %v3385_v9 }
 0x8f8   : > { %3156 = vmatprep.mubr.msk.f32.mxu1 %vm3805_vm12, %v3387_v10 }
 0x8fb   : > { %3157 = vmatmul.mubr.msk.f32.gmra.mxu1 %vm3806_vm11, %v3393_v11 }
 0x8fc   : > { %3181 = vmatprep.mubr.msk.f32.mxu1 %vm3795_vm0, %v3247_v1 }
 0x9ab   : > { %v1787_v5 = vpop.f32.mrf.mxu1 }
 0x9ac   : > { %v1788_v6 = vadd.f32 %v3639_v4, %v1787_v5 }
 0x9ad   : > { %v3144_v7 = vpop.f32.mrf.mxu1 }
 0x9ae   : > { %1991 = vrot.lane.b32.xlu1 %v1788_v6, %s3249_s24  ;;  %3160 = vmatpush3.msra.mxu0 %v1788_v6  ;;  %v1909_v15 = vrot.slane %v1788_v6, %v3423_v30  ;;  %v1902_v16 = vcombine.high %v1788_v6, %v1788_v6 }
 0x9af   : > { %v3149_v8 = vpop.f32.mrf.mxu1  ;;  %3164 = vmatprep.subr.mxu0 %v3247_v1 }
 0x9b0   : > { %2012 = vrot.lane.b32.xlu0 %v3149_v8, %s3249_s24  ;;  %v1917_v17 = vcombine.high %v1909_v15, %v1909_v15  ;;  %v1916_v20 = vrot.slane %v1902_v16, %v3423_v30  ;;  %v1925_v21 = vrot.slane %v1909_v15, %v3423_v30 }
 0x9b1   : > { %v1862_v9 = vpop.f32.mrf.mxu1 }
 0x9b2   : > { %2010 = vrot.lane.b32.xlu1 %v1862_v9, %s3249_s24  ;;  %v1939_v18 = vrot.slane %v1917_v17, %v3423_v30  ;;  %v1918_v24 = vcombine.high %v1916_v20, %v1916_v20  ;;  %v1947_v25 = vcombine.high %v1925_v21, %v1925_v21  ;;  %v1954_v28 = vrot.slane %v1925_v21, %v3429_v36 }
 0x9b3   : > { %v3152_v10 = vpop.f32.mrf.mxu1  ;;  %v1932_v38 = vrot.slane %v1916_v20, %v3423_v30 }
 0x9b4   : > { %2016 = vrot.lane.b32.xlu0 %v3152_v10, %s3249_s24  ;;  %v1958_v23 = vrot.slane %v1939_v18, %v3429_v36  ;;  %v1949_v29 = vcombine.high %v1939_v18, %v1939_v18  ;;  %v1946_v33 = vrot.slane %v1918_v24, %v3423_v30  ;;  %v1962_v34 = vrot.slane %v1947_v25, %v3429_v36 }
 0x9b5   : > { %v1872_v11 = vpop.f32.mrf.mxu1  ;;  %v1970_v47 = vrot.slane %v1932_v38, %v3429_v36  ;;  %v1948_v48 = vcombine.high %v1932_v38, %v1932_v38 }
 0x9b6   : > { %2014 = vrot.lane.b32.xlu1 %v1872_v11, %s3249_s24  ;;  %v1966_v40 = vrot.slane %v1949_v29, %v3429_v36  ;;  %v1974_v45 = vrot.slane %v1946_v33, %v3429_v36  ;;  %v1950_v12 = vcombine.high %v1946_v33, %v1946_v33 }
 0x9b7   : > { %v3155_v13 = vpop.f32.mrf.mxu1  ;;  %v1978_v57 = vrot.slane %v1948_v48, %v3429_v36 }
 0x9b8   : > { %2020 = vrot.lane.b32.xlu0 %v3155_v13, %s3249_s24 }
 0x9b9   : > { %v1882_v63 = vpop.f32.mrf.mxu1 }
 0x9ba   : > { %2018 = vrot.lane.b32.xlu1 %v1882_v63, %s3249_s24  ;;  %v1982_v63 = vrot.slane %v1950_v12, %v3429_v36 }
 0x9bb   : > { %v3158_v2 = vpop.f32.mrf.mxu1 }
 0x9bc   : > { %2073 = vrot.lane.b32.xlu0 %v3016_v0, %s3249_s24 }
 0x9bd   : > { %v1892_v14 = vpop.f32.mrf.mxu1 }
 0x9be   : > { %2022 = vrot.lane.b32.xlu1 %v1892_v14, %s3249_s24 }
 0x9c2   : > { %2024 = vrot.lane.b32.xlu1 %v3158_v2, %s3249_s24 }
 0xa20   : > { %v1992_v22 = vpop.permute.xlu1 %1991 }
 0xa21   : > { %v1995_v26 = vadd.f32 %v1992_v22, %v1958_v23  ;;  %v1994_v31 = vadd.f32 %v1992_v22, %v1954_v28  ;;  %v1996_v42 = vadd.f32 %v1992_v22, %v1962_v34  ;;  %v1997_v43 = vadd.f32 %v1992_v22, %v1966_v40 }
 0xa22   : > { %v2013_v27 = vpop.permute.xlu0 %2012  ;;  %v1999_v52 = vadd.f32 %v1992_v22, %v1974_v45  ;;  %v1998_v30 = vadd.f32 %v1992_v22, %v1970_v47  ;;  %v2000_v5 = vadd.f32 %v1992_v22, %v1978_v57  ;;  %v2001_v2 = vadd.f32 %v1992_v22, %v1982_v63 }
 0xa23   : > { %v2035_v35 = vadd.f32 %v2013_v27, %v1995_v26 }
 0xa24   : > { %v2011_v32 = vpop.permute.xlu1 %2010 }
 0xa25   : > { %v2034_v37 = vadd.f32 %v2011_v32, %v1994_v31  ;;  %v2051_v49 = vmul.f32 0.2, %v2035_v35  ;;  %vm2043_vm9 = vcmp.ge.f32.partialorder %v2035_v35, 0.0 }
 0xa26   : > { %v2017_v41 = vpop.permute.xlu0 %2016 }
 0xa27   : > { %v2050_v50 = vmul.f32 0.2, %v2034_v37  ;;  %v2037_v51 = vadd.f32 %v2017_v41, %v1997_v43  ;;  %vm2042_vm10 = vcmp.ge.f32.partialorder %v2034_v37, 0.0  ;;  %v2059_v61 = vsel %vm2043_vm9, %v2035_v35, %v2051_v49 }
 0xa28   : > { %v2015_v44 = vpop.permute.xlu1 %2014 }
 0xa29   : > { %v2036_v46 = vadd.f32 %v2015_v44, %v1996_v42  ;;  %v2053_v58 = vmul.f32 0.2, %v2037_v51  ;;  %v2058_v60 = vsel %vm2042_vm10, %v2034_v37, %v2050_v50  ;;  %vm2045_vm2 = vcmp.ge.f32.partialorder %v2037_v51, 0.0 }
 0xa2a   : > { %v2021_v3 = vpop.permute.xlu0 %2020 }
 0xa2b   : > { %v2052_v53 = vmul.f32 0.2, %v2036_v46  ;;  %v2039_v54 = vadd.f32 %v2021_v3, %v1999_v52  ;;  %vm2044_vm1 = vcmp.ge.f32.partialorder %v2036_v46, 0.0  ;;  %v2061_v0 = vsel %vm2045_vm2, %v2037_v51, %v2053_v58 }
 0xa2c   : > { %v2019_v55 = vpop.permute.xlu1 %2018  ;;  %vm2687_vm2 = vcmask 1040384  }
 0xa2d   : > { %v2038_v56 = vadd.f32 %v2019_v55, %v1998_v30  ;;  %v2055_v8 = vmul.f32 0.2, %v2039_v54  ;;  %v2060_v11 = vsel %vm2044_vm1, %v2036_v46, %v2052_v53  ;;  %vm2047_vm4 = vcmp.ge.f32.partialorder %v2039_v54, 0.0 }
 0xa2e   : > { %v2074_v59 = vpop.permute.xlu0 %2073  ;;  %vm3813_vm1 = vcmask 1042432  }
 0xa2f   : > { %v2076_v6 = vmul.f32 %v2074_v59, %v2058_v60  ;;  %v2077_v7 = vmul.f32 %v2074_v59, %v2059_v61  ;;  %v2054_v9 = vmul.f32 0.2, %v2038_v56  ;;  %vm2046_vm12 = vcmp.ge.f32.partialorder %v2038_v56, 0.0 }
 0xa30   : > { %v2023_v10 = vpop.permute.xlu1 %2022  ;;  %v2078_v14 = vmul.f32 %v2074_v59, %v2060_v11  ;;  %v2079_v15 = vmul.f32 %v2074_v59, %v2061_v0  ;;  %v2063_v20 = vsel %vm2047_vm4, %v2039_v54, %v2055_v8  ;;  %vm2458_vm4 = vcmask 39936  }
 0xa31   : > { %v2040_v13 = vadd.f32 %v2023_v10, %v2000_v5  ;;  %2092 = vrot.lane.b32.xlu0 %v2076_v6, %s3251_s29  ;;  %2094 = vrot.lane.b32.xlu1 %v2077_v7, %s3251_s29  ;;  %v2062_v18 = vsel %vm2046_vm12, %v2038_v56, %v2054_v9  ;;  %v2081_v25 = vmul.f32 %v2074_v59, %v2063_v20  ;;  %vm2695_vm12 = vcmask 1045504  }
 0xa32   : > { %v2080_v24 = vmul.f32 %v2074_v59, %v2062_v18 }
 0xa33   : > { %v2056_v16 = vmul.f32 0.2, %v2040_v13  ;;  %vm2048_vm11 = vcmp.ge.f32.partialorder %v2040_v13, 0.0 }
 0xa34   : > { %v2025_v17 = vpop.permute.xlu1 %2024 }
 0xa35   : > { %v2041_v21 = vadd.f32 %v2025_v17, %v2001_v2  ;;  %2096 = vrot.lane.b32.xlu0 %v2078_v14, %s3251_s29  ;;  %2098 = vrot.lane.b32.xlu1 %v2079_v15, %s3251_s29  ;;  %v2064_v26 = vsel %vm2048_vm11, %v2040_v13, %v2056_v16  ;;  %vm2691_vm11 = vcmask 48128  }
 0xa36   : > { %v2082_v27 = vmul.f32 %v2074_v59, %v2064_v26 }
 0xa37   : > { %vm2049_vm9 = vcmp.ge.f32.partialorder %v2041_v21, 0.0  ;;  %v2057_v23 = vmul.f32 0.2, %v2041_v21 }
 0xa39   : > { %2100 = vrot.lane.b32.xlu0 %v2080_v24, %s3251_s29  ;;  %2102 = vrot.lane.b32.xlu1 %v2081_v25, %s3251_s29  ;;  %v2065_v36 = vsel %vm2049_vm9, %v2041_v21, %v2057_v23  ;;  %vm2788_vm9 = vcmask 1041408  }
 0xa3a   : > { %v2083_v22 = vmul.f32 %v2074_v59, %v2065_v36 }
 0xa3d   : > { %2104 = vrot.lane.b32.xlu0 %v2082_v27, %s3251_s29  ;;  %2106 = vrot.lane.b32.xlu1 %v2083_v22, %s3251_s29  ;;  %v2448_v27 = vld [vmem:[%s3784_s10] sm:$0xff] }
 0xaa3   : > { %v2093_v28 = vpop.permute.xlu0 %2092  ;;  %v2095_v29 = vpop.permute.xlu1 %2094 }
 0xaa4   : > { %v2116_v31 = vsel %vm520_vm3, %v2093_v28, 0.0  ;;  %v2119_v32 = vsel %vm520_vm3, %v2095_v29, 0.0  ;;  %v3019_v28 = vld [vmem:[%s3786_s12] ss:$0 sm:$0xff] }
 0xaa5   : > { %2117 = vadd.xlane.f32.xlu0 %v2116_v31  ;;  %2120 = vadd.xlane.f32.xlu1 %v2119_v32 }
 0xaa7   : > { %v2097_v33 = vpop.permute.xlu0 %2096  ;;  %v2099_v34 = vpop.permute.xlu1 %2098 }
 0xaa8   : > { %v2125_v38 = vsel %vm520_vm3, %v2099_v34, 0.0  ;;  %v2122_v41 = vsel %vm520_vm3, %v2097_v33, 0.0 }
 0xaa9   : > { %2126 = vadd.xlane.f32.xlu0 %v2125_v38 }
 0xaab   : > { %v2101_v35 = vpop.permute.xlu0 %2100  ;;  %v2103_v37 = vpop.permute.xlu1 %2102 }
 0xaac   : > { %v2128_v40 = vsel %vm520_vm3, %v2101_v35, 0.0  ;;  %v2131_v44 = vsel %vm520_vm3, %v2103_v37, 0.0  ;;  %v2374_v35 = vld [vmem:[%s495_s15] sm:$0x7] }
 0xaad   : > { %2129 = vadd.xlane.f32.xlu1 %v2128_v40  ;;  %2123 = vadd.xlane.f32.xlu0 %v2122_v41  ;;  %v2455_v40 = vrot.slane %v2448_v27, 5  ;;  %v2449_v41 = vld [vmem:[%s3784_s10 + $0x8] sm:$0xff] }
 0xaaf   : > { %v2105_v42 = vpop.permute.xlu0 %2104  ;;  %v2107_v45 = vpop.permute.xlu1 %2106 }
 0xab0   : > { %v2134_v43 = vsel %vm520_vm3, %v2105_v42, 0.0  ;;  %v2137_v46 = vsel %vm520_vm3, %v2107_v45, 0.0  ;;  %v2456_v42 = vrot.slane %v2449_v41, 5  ;;  %v2688_v45 = vrot.slane %v2449_v41, 7 }
 0xab1   : > { %2135 = vadd.xlane.f32.xlu1 %v2134_v43  ;;  %2132 = vadd.xlane.f32.xlu0 %v2131_v44  ;;  %v2450_v44 = vld [vmem:[%s3784_s10 + $0x10] sm:$0x1f] }
 0xab2   : > { %v2457_v43 = vsel %vm3813_vm1, %v2455_v40, %v2456_v42 }
 0xab5   : > { %2138 = vadd.xlane.f32.xlu0 %v2137_v46  ;;  %v2689_v46 = vrot.slane %v2450_v44, 7 }
 0xb2e   : > { %v2118_v47 = vpop.xlane.xlu0 %2117  ;;  %v2121_v48 = vpop.xlane.xlu1 %2120 }
 0xb2f   : > { %v2151_v50 = vrot.slane %v2118_v47, %v3460_v19  ;;  %v2155_v51 = vrot.slane %v2121_v48, %v3460_v19  ;;  %v2690_v47 = vsel %vm2687_vm2, %v2688_v45, %v2689_v46 }
 0xb31   : > { %v2180_v53 = vsel %vm1014_vm13, %v2155_v51, %v2151_v50  ;;  %vm3807_vm13 = vcmp.gt.f32.partialorder %v3477_v39, 0.0 }
 0xb32   : > { %v2127_v49 = vpop.xlane.xlu0 %2126 }
 0xb33   : > { %v2163_v54 = vrot.slane %v2127_v49, %v3460_v19  ;;  %v2609_v49 = vrot.slane %v2449_v41, 2 }
 0xb36   : > { %v2124_v52 = vpop.xlane.xlu0 %2123  ;;  %v2130_v3 = vpop.xlane.xlu1 %2129 }
 0xb37   : > { %v2159_v30 = vrot.slane %v2124_v52, %v3460_v19  ;;  %v2167_v56 = vrot.slane %v2130_v3, %v3460_v19 }
 0xb39   : > { %v2181_v55 = vsel %vm1016_vm14, %v2159_v30, %v2180_v53  ;;  %vm3808_vm14 = vcmask 64512   ;;  %v2780_v30 = vld [vmem:[%s3785_s11 + $0x8] sm:$0x3]  ;;  %v2779_v53 = vld [vmem:[%s3785_s11] sm:$0xff] }
 0xb3a   : > { %v2182_v57 = vsel %vm1018_vm15, %v2163_v54, %v2181_v55  ;;  %v2133_v12 = vpop.xlane.xlu0 %2132  ;;  %v2136_v58 = vpop.xlane.xlu1 %2135  ;;  %vm3809_vm15 = vmmov %vm3808_vm14 }
 0xb3b   : > { %v2183_v59 = vsel %vm1020_vm5, %v2167_v56, %v2182_v57  ;;  %v2171_v60 = vrot.slane %v2133_v12, %v3460_v19  ;;  %v2175_v61 = vrot.slane %v2136_v58, %v3460_v19  ;;  %vm3810_vm5 = vmmov %vm3808_vm14 }
 0xb3c   : > { %vm3812_vm10 = vmmov %vm3810_vm5 }
 0xb3d   : > { %v2184_v5 = vsel %vm1022_vm6, %v2171_v60, %v2183_v59  ;;  %vm3811_vm6 = vcmask 1043456  }
 0xb3e   : > { %v2139_v6 = vpop.xlane.xlu0 %2138  ;;  %v2185_v8 = vsel %vm1024_vm7, %v2175_v61, %v2184_v5 }
 0xb3f   : > { %v2179_v7 = vrot.slane %v2139_v6, %v3460_v19 }
 0xb41   : > { %v2186_v9 = vsel %vm1026_vm8, %v2179_v7, %v2185_v8  ;;  %vm2461_vm8 = vcmask 1044480  }
 0xb42   : > { %v2188_v10 = vsel %vm3807_vm13, %v2186_v9, -1e+30  ;;  %3180 = vmatpush3.msk.msra.mxu1 %vm2461_vm8, %v2448_v27 }
 0xb43   : > { %v2189_v11 = vsel %vm3808_vm14, %v2188_v10, -inf  ;;  %3189 = vmatprep.subr.mxu1 %v3247_v1  ;;  %vm2862_vm14 = vcmask 0  }
 0xb44   : > { %2190 = vmax.xlane.f32.xlu1 %v2189_v11 }
 0xb55   : > { %2201 = vrot.lane.b32.xlu1 %v3639_v4, %s3252_s14  ;;  %v2285_v4 = vld [vmem:[%s3783_s9] sm:$0xf]  ;;  %s498_s14 = scalar_lea.vmem %s3778_s4, %s3815_s26 }
 0xb56   : > { %v2685_v52 = vld [vmem:[%s498_s14] sm:$0x1] }
 0xb59   : > { %2781 = vrot.lane.b32.xlu1 %v3019_v28, %s3254_s28 }
 0xbcd   : > { %v2191_v13 = vpop.xlane.xlu1 %2190 }
 0xbce   : > { %v2192_v63 = vsub.f32 %v2188_v10, %v2191_v13 }
 0xbd0   : > { %v2193_v0 = vmul.f32 1.442695, %v2192_v63 }
 0xbd2   : > { %3229 = vpow2.f32 %v2193_v0 }
 0xbdf   : > { %v3230_v2 = vpop.eup %3229 }
 0xbe0   : > { %v2195_v19 = vmul.f32 %v3230_v2, %v3477_v39  ;;  %v2202_v39 = vpop.permute.xlu1 %2201 }
 0xbe2   : > { %v2196_v14 = vsel %vm3809_vm15, %v2195_v19, 0.0 }
 0xbe3   : > { %2197 = vadd.xlane.f32.xlu0 %v2196_v14 }
 0xbe4   : > { %v2782_v63 = vpop.permute.xlu1 %2781 }
 0xbf9   : > { %2769 = vrot.lane.b32.xlu0 %v3019_v28, %s3253_s18 }
 0xc6c   : > { %v2198_v15 = vpop.xlane.xlu0 %2197 }
 0xc6d   : > { %3231 = vrcp.f32 %v2198_v15 }
 0xc70   : > { %v2770_v6 = vpop.permute.xlu0 %2769 }
 0xc7a   : > { %v3232_v16 = vpop.eup %3231 }
 0xc7b   : > { %v2200_v17 = vmul.f32 %v3232_v16, %v2195_v19 }
 0xc7d   : > { %3162 = vmatmul.mubr.msk.f32.vlgmr.msra.gmra.mxu0 %vm3810_vm5, %v2200_v17 }
 0xc7e   : > { %3166 = vmatprep.mubr.msk.f32.mxu0 %vm3795_vm0, %v3247_v1  ;;  %3165 = vmatpush3.msk.msra.mxu0 %vm3811_vm6, %v2285_v4 }
 0xc7f   : > { %3169 = vmatprep.subr.mxu0 %v3247_v1 }
 0xd3d   : > { %v2273_v18 = vpop.f32.mrf.mxu0 }
 0xd3e   : > { %v2274_v20 = vadd.f32 %v2273_v18, %v2202_v39 }
 0xd3f   : > { %v3163_v21 = vpop.f32.mrf.mxu0 }
 0xd40   : > { %v2278_v23 = vmin.f32 %v2274_v20, 0.0  ;;  %vm2277_vm7 = vcmp.gt.f32.partialorder %v2274_v20, 0.0 }
 0xd42   : > { %v2279_v24 = vmul.f32 1.442695, %v2278_v23 }
 0xd44   : > { %3233 = vpow2.f32 %v2279_v24 }
 0xd51   : > { %v3234_v25 = vpop.eup %3233 }
 0xd52   : > { %v3018_v26 = vadd.f32 -1.0, %v3234_v25 }
 0xd54   : > { %v2282_v36 = vsel %vm2277_vm7, %v2274_v20, %v3018_v26 }
 0xd55   : > { %v2283_v22 = vadd.f32 %v2282_v36, %v3612_v62 }
 0xd57   : > { %3167 = vmatmul.mubr.msk.f32.vlgmr.msra.gmra.mxu0 %vm520_vm3, %v2283_v22 }
 0xd58   : > { %3171 = vmatprep.mubr.msk.f32.mxu0 %vm3795_vm0, %v3247_v1 }
 0xe17   : > { %v2364_v29 = vpop.f32.mrf.mxu0 }
 0xe18   : > { %v2365_v62 = vadd.f32 %v3019_v28, %v2364_v29 }
 0xe19   : > { %v3168_v31 = vpop.f32.mrf.mxu0 }
 0xe1a   : > { %v2369_v32 = vmin.f32 %v2365_v62, 0.0  ;;  %vm2368_vm3 = vcmp.gt.f32.partialorder %v2365_v62, 0.0 }
 0xe1c   : > { %v2370_v33 = vmul.f32 1.442695, %v2369_v32 }
 0xe1e   : > { %3235 = vpow2.f32 %v2370_v33 }
 0xe2b   : > { %v3236_v34 = vpop.eup %3235 }
 0xe2c   : > { %v3022_v38 = vadd.f32 -1.0, %v3236_v34 }
 0xe2e   : > { %v2373_v37 = vsel %vm2368_vm3, %v2365_v62, %v3022_v38 }
 0xe2f   : > { %3170 = vmatpush3.msra.mxu0 %v2373_v37 }
 0xe30   : > { %3172 = vmatmul.mubr.msk.f32.vlgmr.msra.gmra.mxu0 %vm3812_vm10, %v2374_v35  ;;  %3174 = vmatprep.subr.mxu0 %v3247_v1 }
 0xe31   : > { %3176 = vmatprep.mubr.msk.f32.mxu0 %vm3795_vm0, %v3247_v1  ;;  %3175 = vmatpush3.msk.msra.mxu0 %vm2461_vm8, %v2457_v43 }
 0xe32   : > { %3184 = vmatprep.subr.mxu0 %v3247_v1 }
 0xef0   : > { %v2444_v48 = vpop.f32.mrf.mxu0 }
 0xef1   : > { %v2452_v50 = vrot.slane %v2444_v48, 1  ;;  %3182 = vmatmul.mubr.msk.f32.vlgmr.msra.gmra.mxu1 %vm2458_vm4, %v2444_v48  ;;  %v2608_v3 = vrot.slane %v2444_v48, 2 }
 0xef2   : > { %v3173_v51 = vpop.f32.mrf.mxu0  ;;  %3190 = vmatpush3.msk.msra.mxu1 %vm2695_vm12, %v2690_v47  ;;  %3191 = vmatprep.mubr.msk.f32.mxu1 %vm3795_vm0, %v3247_v1 }
 0xef3   : > { %3177 = vmatmul.mubr.msk.f32.vlgmr.msra.gmra.mxu0 %vm2458_vm4, %v2452_v50 }
 0xef4   : > { %3185 = vmatpush3.msk.msra.mxu0 %vm2461_vm8, %v2609_v49  ;;  %3186 = vmatprep.mubr.msk.f32.mxu0 %vm3795_vm0, %v3247_v1 }
 0xef5   : > { %3192 = vmatmul.mubr.msk.f32.vlgmr.msra.gmra.mxu1 %vm2691_vm11, %v2685_v52  ;;  %3194 = vmatprep.subr.mxu0 %v3247_v1 }
 0xef7   : > { %3187 = vmatmul.mubr.msk.f32.vlgmr.msra.gmra.mxu0 %vm2458_vm4, %v2608_v3 }
 0xef8   : > { %3198 = vmatprep.mubr.msk.f32.mxu0 %vm3795_vm0, %v3247_v1  ;;  %3195 = vmatpush3.msk.msra.mxu0 %vm2788_vm9, %v2780_v30  ;;  %vm2784_vm0 = vcmask 80896  }
 0xef9   : > { %3196 = vmatprep.subr.mxu0 %v3247_v1 }
 0xefa   : > { %3197 = vmatpush3.msra.mxu0 %v2779_v53 }
 0xfb1   : > { %v2604_v54 = vpop.f32.mrf.mxu1 }
 0xfb3   : > { %v2530_v55 = vpop.f32.mrf.mxu0  ;;  %v3183_v56 = vpop.f32.mrf.mxu1 }
 0xfb4   : > { %v2605_v58 = vadd.f32 %v2604_v54, %v2530_v55 }
 0xfb5   : > { %v3178_v57 = vpop.f32.mrf.mxu0  ;;  %v2764_v12 = vpop.f32.mrf.mxu1 }
 0xfb7   : > { %v2680_v59 = vpop.f32.mrf.mxu0  ;;  %v3193_v60 = vpop.f32.mrf.mxu1 }
 0xfb8   : > { %v2684_v61 = vadd.f32 %v2680_v59, %v2605_v58 }
 0xfb9   : > { %v3188_v5 = vpop.f32.mrf.mxu0 }
 0xfba   : > { %v2768_v1 = vadd.f32 %v2764_v12, %v2684_v61 }
 0xfbc   : > { %v2772_v7 = vadd.f32 %v2770_v6, %v2768_v1 }
 0xfbe   : > { %v2774_v8 = vmin.f32 %v2772_v7, 0.0  ;;  %vm2773_vm13 = vcmp.gt.f32.partialorder %v2772_v7, 0.0 }
 0xfc0   : > { %v2775_v9 = vmul.f32 1.442695, %v2774_v8 }
 0xfc2   : > { %3237 = vpow2.f32 %v2775_v9 }
 0xfcf   : > { %v3238_v10 = vpop.eup %3237 }
 0xfd0   : > { %v3032_v11 = vadd.f32 -1.0, %v3238_v10 }
 0xfd2   : > { %v2778_v13 = vsel %vm2773_vm13, %v2772_v7, %v3032_v11 }
 0xfd3   : > { %3199 = vmatmul.mubr.msk.f32.vlgmr.msra.gmra.mxu0 %vm2784_vm0, %v2778_v13 }
0x1093   : > { %v2858_v0 = vpop.f32.mrf.mxu0 }
0x1094   : > { %v2859_v2 = vadd.f32 %v2858_v0, %v2782_v63 }
0x1095   : > { %v3200_v19 = vpop.f32.mrf.mxu0 }
0x1096   : > { %2863 = vst.msk [vmem:[%s501_s16] sm:$0x1] %vm2862_vm14, %v2859_v2 }
0x1097 PF: > { %s23_s25 = sadd.s32 1, %s3245_s25  }
0x1098   : > { %p20_p4 = scmp.ge.s32.totalorder %s23_s25, 4  }
0x109a   :  { %22 = sbr.rel (!%p20_p4) target bundleno = 1 (0x1), region = 122 }

</bundles_post_ra>
